<compile_context>
chip_gen: v6e
topology: v6e:2x2x1
jax: 0.10.0
libtpu: 0.0.40
codegen_flags: <defaults>
</compile_context>

<pallas_src>
import jax
import jax.numpy as jnp
from jax.experimental import pallas as pl
from jax.experimental.pallas import tpu as pltpu


_LN_EPS = 1e-5          # matches torch.nn.LayerNorm default
_DISP_PAD = 128         # lane padding for the displacement selection columns


def _round_up(n, m):
    return ((n + m - 1) // m) * m


# ------------------------------- the kernel ---------------------------------
def edge_processor_kernel(
    edge_ref,    # (TE, Dtot)        bf16  [h_i | h_j | edge_type | x_i | x_j]
    w1d_ref,     # (Dtot, 128 + 2H)  bf16  [disp selection | fused layer-1 of both branches]
    wsum_ref,    # (128, 2H)         bf16  ones in first Dx rows -> sum(disp^2) lane-broadcast
    w2_ref,      # (2H, 2H)          bf16  blkdiag(wh2, wx2)
    wnorm_ref,   # (2H, 2H)          bf16  blkdiag(J/H, J/H) -> per-branch mean broadcast
    wo_ref,      # (2H, H)           bf16  embedding_out weight
    aux_ref,     # (8, 2H)           f32   rows: b1 | w_len | b2 | gamma | beta | 0 | 0 | 0
    bo_ref,      # (1, H)            f32   embedding_out bias
    out_ref,     # (TE, H)           bf16
):
    f32 = jnp.float32
    bf16 = jnp.bfloat16

    x = edge_ref[...]                          # stays bf16: MXU LHS fed natively
    aux = aux_ref[...]
    b1, w_len, b2 = aux[0:1], aux[1:2], aux[2:3]
    gamma, beta = aux[3:4], aux[4:5]

    # One fused MXU pass over the edge features:
    #   columns [0:128)     -> x_j - x_i (zeros beyond Dx)
    #   columns [128:128+2H) -> first layer of edge_mlp_h | edge_mlp_x
    y = jnp.dot(x, w1d_ref[...], preferred_element_type=f32)      # (TE, 128 + 2H) f32
    disp = y[:, :_DISP_PAD]                                        # vreg-aligned split (free)
    z = y[:, _DISP_PAD:]                                           # (TE, 2H)

    # |x_j - x_i| broadcast to all 2H lanes via the MXU (no XLU reduce/broadcast).
    sumsq = jnp.dot((disp * disp).astype(bf16), wsum_ref[...],
                    preferred_element_type=f32)                    # (TE, 2H)
    z = z + jnp.sqrt(sumsq) * w_len + b1
    z = z * jax.nn.sigmoid(z)                                      # SiLU, f32 (EUP)

    # Fused (block-diagonal) second layer of both branches.
    z2 = jnp.dot(z.astype(bf16), w2_ref[...], preferred_element_type=f32) + b2   # (TE, 2H) f32

    # Per-branch LayerNorm: push both statistics matmuls back-to-back with the
    # same RHS resident; variance = E[z^2] - m^2, clamped against cancellation.
    m = jnp.dot(z2.astype(bf16), wnorm_ref[...], preferred_element_type=f32)
    ez2 = jnp.dot((z2 * z2).astype(bf16), wnorm_ref[...], preferred_element_type=f32)
    v = jnp.maximum(ez2 - m * m, 0.0)
    n = (z2 - m) * jax.lax.rsqrt(v + _LN_EPS) * gamma + beta       # (TE, 2H) f32

    # embedding_out on the stacked [out_h | out_x] activation: one (2H, H) dot.
    out = jnp.dot(n.astype(bf16), wo_ref[...], preferred_element_type=f32) + bo_ref[...]
    out_ref[...] = out.astype(out_ref.dtype)


# ------------------------------- wrapper -------------------------------------
def edge_processor_pallas(h_i, h_j, x_i, x_j, edge_type, packed, *,
                          tile_e=2048, min_grid_steps=8,
                          input_dtype=jnp.bfloat16, out_dtype=jnp.bfloat16):
    E, Dh = h_i.shape
    De = edge_type.shape[-1]
    Dx = x_i.shape[-1]
    H = packed["wo"].shape[-1]
    Dtot = 2 * Dh + De + 2 * Dx

    # TODO(synk): in the full model the producer op should emit this packed bf16
    # edge array directly so the concat/cast/pad below is not an extra HBM
    # read+write pass over the edge features.
    edge_in = jnp.concatenate([h_i, h_j, edge_type, x_i, x_j], axis=-1)
    edge_in = edge_in.astype(input_dtype)

    # Tile choice: large tiles amortize per-step overhead, but cap the tile so
    # there are at least `min_grid_steps` grid steps (v7x megacore sharding +
    # DMA/compute overlap). Rows kept a multiple of 128; padded rows are
    # independent and sliced off at the end.
    te_cap = max(128, _round_up(pl.cdiv(E, min_grid_steps), 128))
    te = min(_round_up(max(tile_e, 128), 128), te_cap)
    Ep = _round_up(E, te)
    if Ep != E:
        edge_in = jnp.pad(edge_in, ((0, Ep - E), (0, 0)))

    grid = (Ep // te,)

    weights = [packed[k] for k in ("w1d", "wsum", "w2", "wnorm", "wo", "aux", "bo")]

    in_specs = [pl.BlockSpec((te, Dtot), lambda i: (i, 0))] + [
        pl.BlockSpec(w.shape, lambda i: (0, 0)) for w in weights
    ]
    out_spec = pl.BlockSpec((te, H), lambda i: (i, 0))

    fn = pl.pallas_call(
        edge_processor_kernel,
        out_shape=jax.ShapeDtypeStruct((Ep, H), out_dtype),
        grid_spec=pltpu.PrefetchScalarGridSpec(
            num_scalar_prefetch=0,
            grid=grid,
            in_specs=in_specs,
            out_specs=out_spec,
        ),
        compiler_params=pltpu.CompilerParams(
            dimension_semantics=("parallel",),   # shard edge tiles over both TCs (v7x)
        ),
    )
    out = fn(edge_in, *weights)
    return out[:E]


# --------------------------- parameter construction --------------------------
def make_params(key, Dh, De, Dx, H):
    """Synthetic parameters matching EdgeProcessor.__init__ with
         hidden_size_list_h = [2*Dh + De, H, H]
         hidden_size_list_x = [Dx + 1,   H, H]
         embedding_out      = Linear(2*H, H)
       Weights kept in (in, out) layout: y = x @ W + b."""
    ks = jax.random.split(key, 10)

    def lin_w(k, fan_in, fan_out):
        lim = 1.0 / jnp.sqrt(fan_in)
        return jax.random.uniform(k, (fan_in, fan_out), jnp.float32, -lim, lim)

    def lin_b(k, fan_in, fan_out):
        lim = 1.0 / jnp.sqrt(fan_in)
        return jax.random.uniform(k, (fan_out,), jnp.float32, -lim, lim)

    Din_h = 2 * Dh + De
    Din_x = Dx + 1
    f32 = jnp.float32
    return dict(
        wh1=lin_w(ks[0], Din_h, H), bh1=lin_b(ks[1], Din_h, H),
        wh2=lin_w(ks[2], H, H),     bh2=lin_b(ks[3], H, H),
        gln_h=jnp.ones((H,), f32),  bln_h=jnp.zeros((H,), f32),
        wx1=lin_w(ks[4], Din_x, H), bx1=lin_b(ks[5], Din_x, H),
        wx2=lin_w(ks[6], H, H),     bx2=lin_b(ks[7], H, H),
        gln_x=jnp.ones((H,), f32),  bln_x=jnp.zeros((H,), f32),
        wo=lin_w(ks[8], 2 * H, H),  bo=lin_b(ks[9], 2 * H, H),
    )


def pack_params(p, Dh, De, Dx, H):
    """Fuse the module's 18 small parameter tensors into a few wide constants.
    Matmul weight slabs are stored in bf16 (native MXU rate); the elementwise
    bias/scale slab stays f32."""
    f32 = jnp.float32
    bf16 = jnp.bfloat16
    Dcat = 2 * Dh + De            # width of [h_i | h_j | edge_type]
    Dtot = Dcat + 2 * Dx
    H2 = 2 * H

    wx1_v = p["wx1"][:Dx]         # (Dx, H)  displacement-vector rows
    wx1_l = p["wx1"][Dx:Dx + 1]   # (1, H)   displacement-length row
    eye = jnp.eye(Dx, dtype=f32)

    # Fused first-layer weight with the displacement-selection columns FIRST
    # (lanes [0:128)), so the kernel-side split at lane 128 is vreg-aligned:
    #   cols [0:128)          : edge_in @ w1d -> [x_j - x_i | zeros]
    #   cols [128:128+H)      : h-branch first layer
    #   cols [128+H:128+2H)   : x-branch first layer (displacement part folded in)
    w1d = jnp.zeros((Dtot, _DISP_PAD + H2), f32)
    w1d = w1d.at[Dcat:Dcat + Dx, :Dx].set(-eye)                 # x_i rows (selection)
    w1d = w1d.at[Dcat + Dx:, :Dx].set(eye)                      # x_j rows (selection)
    w1d = w1d.at[:Dcat, _DISP_PAD:_DISP_PAD + H].set(p["wh1"])  # h branch
    w1d = w1d.at[Dcat:Dcat + Dx, _DISP_PAD + H:].set(-wx1_v)    # x_i rows
    w1d = w1d.at[Dcat + Dx:, _DISP_PAD + H:].set(wx1_v)         # x_j rows
    w1d = w1d.astype(bf16)                                      # +/-1 and weights (rounded)

    # Ones matrix: (disp*disp) @ wsum = sum(disp^2) broadcast to all 2H lanes.
    wsum = jnp.zeros((_DISP_PAD, H2), f32).at[:Dx, :].set(1.0).astype(bf16)

    # Block-diagonal second layer.
    w2 = jnp.zeros((H2, H2), f32)
    w2 = w2.at[:H, :H].set(p["wh2"])
    w2 = w2.at[H:, H:].set(p["wx2"])
    w2 = w2.astype(bf16)

    # Block-diagonal per-branch averaging matrix for LayerNorm statistics
    # (1/32 is exact in bf16).
    avg = jnp.full((H, H), 1.0 / H, f32)
    wnorm = jnp.zeros((H2, H2), f32)
    wnorm = wnorm.at[:H, :H].set(avg)
    wnorm = wnorm.at[H:, H:].set(avg)
    wnorm = wnorm.astype(bf16)

    # Bias / scale slab (f32): rows b1 | w_len | b2 | gamma | beta | pad x3.
    aux = jnp.zeros((8, H2), f32)
    aux = aux.at[0, :H].set(p["bh1"]).at[0, H:].set(p["bx1"])
    aux = aux.at[1, H:].set(wx1_l[0])               # disp_len weight (x half only)
    aux = aux.at[2, :H].set(p["bh2"]).at[2, H:].set(p["bx2"])
    aux = aux.at[3, :H].set(p["gln_h"]).at[3, H:].set(p["gln_x"])
    aux = aux.at[4, :H].set(p["bln_h"]).at[4, H:].set(p["bln_x"])

    return dict(w1d=w1d, wsum=wsum, w2=w2, wnorm=wnorm,
                wo=p["wo"].astype(bf16), aux=aux, bo=p["bo"].reshape(1, H))


# ------------------------------ JAX reference --------------------------------
def edge_processor_ref(h_i, h_j, x_i, x_j, edge_type, p):
    def ln(x, g, b, eps=_LN_EPS):
        m = x.mean(-1, keepdims=True)
        v = ((x - m) ** 2).mean(-1, keepdims=True)
        return (x - m) / jnp.sqrt(v + eps) * g + b

    zh = jnp.concatenate([h_i, h_j, edge_type], -1) @ p["wh1"] + p["bh1"]
    zh = zh * jax.nn.sigmoid(zh)
    zh = zh @ p["wh2"] + p["bh2"]
    out_h = ln(zh, p["gln_h"], p["bln_h"])

    disp = x_j - x_i
    dl = jnp.linalg.norm(disp, axis=-1, keepdims=True)
    zx = jnp.concatenate([disp, dl], -1) @ p["wx1"] + p["bx1"]
    zx = zx * jax.nn.sigmoid(zx)
    zx = zx @ p["wx2"] + p["bx2"]
    out_x = ln(zx, p["gln_x"], p["bln_x"])

    return jnp.concatenate([out_h, out_x], -1) @ p["wo"] + p["bo"]


# ---------------------------------- main -------------------------------------
if __name__ == "__main__":
    # E deliberately NOT a multiple of the tile to exercise padding; also small
    # enough that the min-grid-steps cap kicks in (grid of 8 x 128-row tiles).
    E, Dh, De, Dx, H = 1000, 16, 8, 3, 32

    key = jax.random.PRNGKey(0)
    k_hi, k_hj, k_xi, k_xj, k_et, k_p = jax.random.split(key, 6)

    def rnd(k, shape):
        # Round inputs to bf16 so the bf16-I/O kernel and the f32 reference
        # consume numerically identical feature values.
        v = jax.random.normal(k, shape, jnp.float32)
        return v.astype(jnp.bfloat16).astype(jnp.float32)

    h_i = rnd(k_hi, (E, Dh))
    h_j = rnd(k_hj, (E, Dh))
    x_i = rnd(k_xi, (E, Dx))
    x_j = rnd(k_xj, (E, Dx))
    edge_type = rnd(k_et, (E, De))

    params = make_params(k_p, Dh, De, Dx, H)
    packed = pack_params(params, Dh, De, Dx, H)

    out = edge_processor_pallas(h_i, h_j, x_i, x_j, edge_type, packed,
                                tile_e=2048, min_grid_steps=8)
    out = jax.block_until_ready(out)
    assert out.shape == (E, H)

    ref = edge_processor_ref(h_i, h_j, x_i, x_j, edge_type, params)
    out_f32 = out.astype(jnp.float32)
    err = jnp.abs(out_f32 - ref)
    max_err = float(jnp.max(err))
    mean_err = float(jnp.mean(err))
    # bf16 MXU operands + bf16 output: tolerance budgeted for bf16 rounding of
    # the weights, intermediates and the output store (exact match not expected).
    assert max_err < 4e-2, f"max abs err {max_err} vs reference"
    assert mean_err < 1e-2, f"mean abs err {mean_err} vs reference"

    print("KERNEL_OK")
</pallas_src>

<mosaic_0001>
module attributes {stable_mosaic.version = 11 : i64} {
  func.func @edge_processor_kernel(%arg0: i32, %arg1: memref<128x46xbf16, #tpu.memory_space<vmem>>, %arg2: memref<46x192xbf16, #tpu.memory_space<vmem>>, %arg3: memref<128x64xbf16, #tpu.memory_space<vmem>>, %arg4: memref<64x64xbf16, #tpu.memory_space<vmem>>, %arg5: memref<64x64xbf16, #tpu.memory_space<vmem>>, %arg6: memref<64x32xbf16, #tpu.memory_space<vmem>>, %arg7: memref<8x64xf32, #tpu.memory_space<vmem>>, %arg8: memref<1x32xf32, #tpu.memory_space<vmem>>, %arg9: memref<128x32xbf16, #tpu.memory_space<vmem>>) attributes {dimension_semantics = [#tpu.dimension_semantics<parallel>], iteration_bounds = array<i64: 8>, scalar_prefetch = 0 : i64, scratch_operands = 0 : i64, tpu.core_type = #tpu.core_type<tc>, window_params = [{transform_indices = @transform_0, window_bounds = array<i64: 128, 46>}, {pipeline_mode = #tpu.pipeline_mode<synchronous>, transform_indices = @transform_1, window_bounds = array<i64: 46, 192>}, {pipeline_mode = #tpu.pipeline_mode<synchronous>, transform_indices = @transform_2, window_bounds = array<i64: 128, 64>}, {pipeline_mode = #tpu.pipeline_mode<synchronous>, transform_indices = @transform_3, window_bounds = array<i64: 64, 64>}, {pipeline_mode = #tpu.pipeline_mode<synchronous>, transform_indices = @transform_4, window_bounds = array<i64: 64, 64>}, {pipeline_mode = #tpu.pipeline_mode<synchronous>, transform_indices = @transform_5, window_bounds = array<i64: 64, 32>}, {pipeline_mode = #tpu.pipeline_mode<synchronous>, transform_indices = @transform_6, window_bounds = array<i64: 8, 64>}, {pipeline_mode = #tpu.pipeline_mode<synchronous>, transform_indices = @transform_7, window_bounds = array<i64: 1, 32>}, {transform_indices = @transform_8, window_bounds = array<i64: 128, 32>}]} {
    %c0 = arith.constant 0 : index
    %c0_0 = arith.constant 0 : index
    %0 = vector.load %arg1[%c0, %c0_0] : memref<128x46xbf16, #tpu.memory_space<vmem>>, vector<128x46xbf16>
    %c0_1 = arith.constant 0 : index
    %c0_2 = arith.constant 0 : index
    %1 = vector.load %arg7[%c0_1, %c0_2] : memref<8x64xf32, #tpu.memory_space<vmem>>, vector<8x64xf32>
    %2 = vector.extract_strided_slice %1 {offsets = [0, 0], sizes = [1, 64], strides = [1, 1]} : vector<8x64xf32> to vector<1x64xf32>
    %3 = vector.extract_strided_slice %1 {offsets = [1, 0], sizes = [1, 64], strides = [1, 1]} : vector<8x64xf32> to vector<1x64xf32>
    %4 = vector.extract_strided_slice %1 {offsets = [2, 0], sizes = [1, 64], strides = [1, 1]} : vector<8x64xf32> to vector<1x64xf32>
    %5 = vector.extract_strided_slice %1 {offsets = [3, 0], sizes = [1, 64], strides = [1, 1]} : vector<8x64xf32> to vector<1x64xf32>
    %6 = vector.extract_strided_slice %1 {offsets = [4, 0], sizes = [1, 64], strides = [1, 1]} : vector<8x64xf32> to vector<1x64xf32>
    %c0_3 = arith.constant 0 : index
    %c0_4 = arith.constant 0 : index
    %7 = vector.load %arg2[%c0_3, %c0_4] : memref<46x192xbf16, #tpu.memory_space<vmem>>, vector<46x192xbf16>
    %cst = arith.constant dense<0.000000e+00> : vector<128x192xf32>
    %8 = tpu.matmul %0, %7, %cst {dimension_numbers = #tpu.dot_dimension_numbers<[1], [0], [0], [1], [0, 0, 1, 1], [], []>} : vector<128x46xbf16>, vector<46x192xbf16>, vector<128x192xf32> -> vector<128x192xf32>
    %9 = vector.extract_strided_slice %8 {offsets = [0, 0], sizes = [128, 128], strides = [1, 1]} : vector<128x192xf32> to vector<128x128xf32>
    %10 = vector.extract_strided_slice %8 {offsets = [0, 128], sizes = [128, 64], strides = [1, 1]} : vector<128x192xf32> to vector<128x64xf32>
    %11 = arith.mulf %9, %9 : vector<128x128xf32>
    %12 = arith.truncf %11 : vector<128x128xf32> to vector<128x128xbf16>
    %c0_5 = arith.constant 0 : index
    %c0_6 = arith.constant 0 : index
    %13 = vector.load %arg3[%c0_5, %c0_6] : memref<128x64xbf16, #tpu.memory_space<vmem>>, vector<128x64xbf16>
    %cst_7 = arith.constant dense<0.000000e+00> : vector<128x64xf32>
    %14 = tpu.matmul %12, %13, %cst_7 {dimension_numbers = #tpu.dot_dimension_numbers<[1], [0], [0], [1], [0, 0, 1, 1], [], []>} : vector<128x128xbf16>, vector<128x64xbf16>, vector<128x64xf32> -> vector<128x64xf32>
    %15 = math.sqrt %14 : vector<128x64xf32>
    %16 = vector.broadcast %3 : vector<1x64xf32> to vector<128x64xf32>
    %17 = arith.mulf %15, %16 : vector<128x64xf32>
    %18 = arith.addf %10, %17 : vector<128x64xf32>
    %19 = vector.broadcast %2 : vector<1x64xf32> to vector<128x64xf32>
    %20 = arith.addf %18, %19 : vector<128x64xf32>
    %21 = arith.negf %20 : vector<128x64xf32>
    %22 = math.exp %21 : vector<128x64xf32>
    %cst_8 = arith.constant 1.000000e+00 : f32
    %23 = vector.broadcast %cst_8 : f32 to vector<128x64xf32>
    %24 = arith.addf %23, %22 : vector<128x64xf32>
    %25 = arith.divf %23, %24 : vector<128x64xf32>
    %26 = arith.mulf %20, %25 : vector<128x64xf32>
    %27 = arith.truncf %26 : vector<128x64xf32> to vector<128x64xbf16>
    %c0_9 = arith.constant 0 : index
    %c0_10 = arith.constant 0 : index
    %28 = vector.load %arg4[%c0_9, %c0_10] : memref<64x64xbf16, #tpu.memory_space<vmem>>, vector<64x64xbf16>
    %cst_11 = arith.constant dense<0.000000e+00> : vector<128x64xf32>
    %29 = tpu.matmul %27, %28, %cst_11 {dimension_numbers = #tpu.dot_dimension_numbers<[1], [0], [0], [1], [0, 0, 1, 1], [], []>} : vector<128x64xbf16>, vector<64x64xbf16>, vector<128x64xf32> -> vector<128x64xf32>
    %30 = vector.broadcast %4 : vector<1x64xf32> to vector<128x64xf32>
    %31 = arith.addf %29, %30 : vector<128x64xf32>
    %32 = arith.truncf %31 : vector<128x64xf32> to vector<128x64xbf16>
    %c0_12 = arith.constant 0 : index
    %c0_13 = arith.constant 0 : index
    %33 = vector.load %arg5[%c0_12, %c0_13] : memref<64x64xbf16, #tpu.memory_space<vmem>>, vector<64x64xbf16>
    %cst_14 = arith.constant dense<0.000000e+00> : vector<128x64xf32>
    %34 = tpu.matmul %32, %33, %cst_14 {dimension_numbers = #tpu.dot_dimension_numbers<[1], [0], [0], [1], [0, 0, 1, 1], [], []>} : vector<128x64xbf16>, vector<64x64xbf16>, vector<128x64xf32> -> vector<128x64xf32>
    %35 = arith.mulf %31, %31 : vector<128x64xf32>
    %36 = arith.truncf %35 : vector<128x64xf32> to vector<128x64xbf16>
    %c0_15 = arith.constant 0 : index
    %c0_16 = arith.constant 0 : index
    %37 = vector.load %arg5[%c0_15, %c0_16] : memref<64x64xbf16, #tpu.memory_space<vmem>>, vector<64x64xbf16>
    %cst_17 = arith.constant dense<0.000000e+00> : vector<128x64xf32>
    %38 = tpu.matmul %36, %37, %cst_17 {dimension_numbers = #tpu.dot_dimension_numbers<[1], [0], [0], [1], [0, 0, 1, 1], [], []>} : vector<128x64xbf16>, vector<64x64xbf16>, vector<128x64xf32> -> vector<128x64xf32>
    %39 = arith.mulf %34, %34 : vector<128x64xf32>
    %40 = arith.subf %38, %39 : vector<128x64xf32>
    %cst_18 = arith.constant 0.000000e+00 : f32
    %41 = vector.broadcast %cst_18 : f32 to vector<128x64xf32>
    %42 = arith.maximumf %40, %41 : vector<128x64xf32>
    %43 = arith.subf %31, %34 : vector<128x64xf32>
    %cst_19 = arith.constant 9.99999974E-6 : f32
    %44 = vector.broadcast %cst_19 : f32 to vector<128x64xf32>
    %45 = arith.addf %42, %44 : vector<128x64xf32>
    %46 = math.rsqrt %45 : vector<128x64xf32>
    %47 = arith.mulf %43, %46 : vector<128x64xf32>
    %48 = vector.broadcast %5 : vector<1x64xf32> to vector<128x64xf32>
    %49 = arith.mulf %47, %48 : vector<128x64xf32>
    %50 = vector.broadcast %6 : vector<1x64xf32> to vector<128x64xf32>
    %51 = arith.addf %49, %50 : vector<128x64xf32>
    %52 = arith.truncf %51 : vector<128x64xf32> to vector<128x64xbf16>
    %c0_20 = arith.constant 0 : index
    %c0_21 = arith.constant 0 : index
    %53 = vector.load %arg6[%c0_20, %c0_21] : memref<64x32xbf16, #tpu.memory_space<vmem>>, vector<64x32xbf16>
    %cst_22 = arith.constant dense<0.000000e+00> : vector<128x32xf32>
    %54 = tpu.matmul %52, %53, %cst_22 {dimension_numbers = #tpu.dot_dimension_numbers<[1], [0], [0], [1], [0, 0, 1, 1], [], []>} : vector<128x64xbf16>, vector<64x32xbf16>, vector<128x32xf32> -> vector<128x32xf32>
    %c0_23 = arith.constant 0 : index
    %c0_24 = arith.constant 0 : index
    %55 = vector.load %arg8[%c0_23, %c0_24] : memref<1x32xf32, #tpu.memory_space<vmem>>, vector<1x32xf32>
    %56 = vector.broadcast %55 : vector<1x32xf32> to vector<128x32xf32>
    %57 = arith.addf %54, %56 : vector<128x32xf32>
    %58 = arith.truncf %57 : vector<128x32xf32> to vector<128x32xbf16>
    %c0_25 = arith.constant 0 : index
    %c0_26 = arith.constant 0 : index
    %59 = vector.load %arg9[%c0_25, %c0_26] : memref<128x32xbf16, #tpu.memory_space<vmem>>, vector<128x32xbf16>
    tpu.vector_store %arg9[%c0_25, %c0_26], %58 {strides = array<i32>} : memref<128x32xbf16, #tpu.memory_space<vmem>>, vector<128x32xbf16>,
    return
  }
  func.func @transform_0(%arg0: i32) -> (i32, i32) {
    %c0_i32 = arith.constant 0 : i32
    %c0_i32_0 = arith.constant 0 : i32
    return %arg0, %c0_i32 : i32, i32
  }
  func.func @transform_1(%arg0: i32) -> (i32, i32) {
    %c0_i32 = arith.constant 0 : i32
    %c0_i32_0 = arith.constant 0 : i32
    %c0_i32_1 = arith.constant 0 : i32
    return %c0_i32, %c0_i32_0 : i32, i32
  }
  func.func @transform_2(%arg0: i32) -> (i32, i32) {
    %c0_i32 = arith.constant 0 : i32
    %c0_i32_0 = arith.constant 0 : i32
    %c0_i32_1 = arith.constant 0 : i32
    return %c0_i32, %c0_i32_0 : i32, i32
  }
  func.func @transform_3(%arg0: i32) -> (i32, i32) {
    %c0_i32 = arith.constant 0 : i32
    %c0_i32_0 = arith.constant 0 : i32
    %c0_i32_1 = arith.constant 0 : i32
    return %c0_i32, %c0_i32_0 : i32, i32
  }
  func.func @transform_4(%arg0: i32) -> (i32, i32) {
    %c0_i32 = arith.constant 0 : i32
    %c0_i32_0 = arith.constant 0 : i32
    %c0_i32_1 = arith.constant 0 : i32
    return %c0_i32, %c0_i32_0 : i32, i32
  }
  func.func @transform_5(%arg0: i32) -> (i32, i32) {
    %c0_i32 = arith.constant 0 : i32
    %c0_i32_0 = arith.constant 0 : i32
    %c0_i32_1 = arith.constant 0 : i32
    return %c0_i32, %c0_i32_0 : i32, i32
  }
  func.func @transform_6(%arg0: i32) -> (i32, i32) {
    %c0_i32 = arith.constant 0 : i32
    %c0_i32_0 = arith.constant 0 : i32
    %c0_i32_1 = arith.constant 0 : i32
    return %c0_i32, %c0_i32_0 : i32, i32
  }
  func.func @transform_7(%arg0: i32) -> (i32, i32) {
    %c0_i32 = arith.constant 0 : i32
    %c0_i32_0 = arith.constant 0 : i32
    %c0_i32_1 = arith.constant 0 : i32
    return %c0_i32, %c0_i32_0 : i32, i32
  }
  func.func @transform_8(%arg0: i32) -> (i32, i32) {
    %c0_i32 = arith.constant 0 : i32
    %c0_i32_0 = arith.constant 0 : i32
    return %arg0, %c0_i32 : i32, i32
  }
}

</mosaic_0001>

<bundles_post_ra>
// kernel: tpu_custom_call.1
= control target key start
LH: loop header
LB: loop body
LE: loop exit
PB: predicated region body
PF: predicated region fallthrough
CT: control target
= control target key end

     0   :  { %s2495_s27 = smov 0   ;;  %s3165_s0 = inlined_call_operand.vmem [shape: bf16[1024,46], index: 0, kind: input, shape index: {}]   ;;  %s3166_s1 = inlined_call_operand.vmem [shape: bf16[46,192], index: 1, kind: input, shape index: {}]   ;;  %s3167_s2 = inlined_call_operand.vmem [shape: bf16[128,64], index: 2, kind: input, shape index: {}]   ;;  %s3168_s3 = inlined_call_operand.vmem [shape: bf16[64,64], index: 3, kind: input, shape index: {}]   ;;  %s3169_s4 = inlined_call_operand.vmem [shape: bf16[64,64], index: 4, kind: input, shape index: {}]   ;;  %s3170_s5 = inlined_call_operand.vmem [shape: bf16[64,32], index: 5, kind: input, shape index: {}]   ;;  %s3171_s6 = inlined_call_operand.vmem [shape: f32[8,64], index: 6, kind: input, shape index: {}]   ;;  %s3172_s7 = inlined_call_operand.vmem [shape: f32[1,32], index: 7, kind: input, shape index: {}]   ;;  %s3173_s8 = inlined_call_operand.vmem [shape: bf16[1024,32], index: 8, kind: output, shape index: {}]  }
   0x1 LB: > { %s1940_s28 = sadd.s32 4294967295, %s2447_s27   ;;  %p1944_p0 = scmp.ge.s32.totalorder %s2447_s27, 1  ;;  %s2447_s27 = sphi %s2495_s27, %s18_s27  }
   0x2   : > { %p263_p1 = scmp.lt.s32.totalorder %s2447_s27, 9 }
   0x4   : > { %p264_p2 = pnand %p1944_p0, %p263_p1 }
   0x5   : > { %s1945_s17 = sshll.u32 (!%p264_p2), %s1940_s28, 4 }
   0x6   : > { %267 = sbr.rel (%p264_p2) target bundleno = 1183 (0x49f), region = 52  ;;  %p298_p3 = scmp.lt.s32.totalorder (!%p264_p2), %s1945_s17, 127 }
   0xb   : > { %v2276_v0 = vld [vmem:[%s3166_s1 + $0x24] ss:$8 sps:$4 sm:$0x7f]   ;;  %vm426_vm0 = vcmask 1046528   ;;  %v2279_v2 = vld [vmem:[%s3166_s1 + $0x14] ss:$8 sps:$4 sm:$0xff]  }
   0xc   : > { %v2278_v1 = vld [vmem:[%s3166_s1 + $0x20] ss:$8 sps:$4 sm:$0x7f]   ;;  %1963 = vmatprep.subr.msk.bf16.mxu0 %vm426_vm0, %v2276_v0  ;;  %v2281_v4 = vld [vmem:[%s3166_s1 + $0x10] ss:$8 sps:$4 sm:$0xff]   ;;  %v2449_v6 = vmov 0  }
   0xd   : > { %v428_v3 = vsel %vm426_vm0, %v2278_v1, 0  ;;  %v2282_v5 = vld [vmem:[%s3166_s1 + $0x4] ss:$8 sps:$4 sm:$0xff]   ;;  %465 = vmatprep.mubr.bf16.mxu0 %v2449_v6  ;;  %v2293_v7 = vld [vmem:[%s3167_s2 + $0x38] sm:$0xff]   ;;  %v2294_v8 = vld [vmem:[%s3167_s2 + $0x30] sm:$0xff]   ;;  %s3175_s17 = smov (!%p298_p3, %s1945_s17), 127 }
   0xe   : > { %444 = vmatpush1.bf16.msra.mxu0 %v428_v3  ;;  %2139 = vmatprep.subr.bf16.mxu1 %v2293_v7  ;;  %v2284_v9 = vld [vmem:[%s3166_s1] ss:$8 sps:$4 sm:$0xff]   ;;  %s1946_s24 = sshll.u32 %s3175_s17, 2  ;;  %vm401_vm1 = vcmask 375808   ;;  %v2297_v20 = vld [vmem:[%s3167_s2 + $0x18] sm:$0xff]   ;;  %v2298_v21 = vld [vmem:[%s3167_s2 + $0x10] sm:$0xff]  }
   0xf   : > { %445 = vmatprep.subr.bf16.mxu0 %v2279_v2  ;;  %2140 = vmatpush3.bf16.msra.mxu1 %v2293_v7  ;;  %v2295_v10 = vld [vmem:[%s3167_s2 + $0x28] sm:$0xff]   ;;  %s301_s30 = scalar_lea.vmem %s3165_s0, %s1946_s24  ;;  %v2296_v12 = vld [vmem:[%s3167_s2 + $0x20] sm:$0xff]   ;;  %s3113_s11 = scalar_lea.vmem %s3173_s8, %s1946_s24 }
  0x10   : > { %2141 = vmatprep.subr.bf16.mxu1 %v2294_v8  ;;  %v2285_v11 = vld [vmem:[%s301_s30] sm:$0xff]   ;;  %v2286_v13 = vld [vmem:[%s301_s30 + $0x8] sm:$0xff]   ;;  %v2287_v14 = vld [vmem:[%s301_s30 + $0x10] sm:$0xff]  }
  0x11   : > { %v2288_v15 = vld [vmem:[%s301_s30 + $0x18] sm:$0xff]   ;;  %v2289_v16 = vld [vmem:[%s301_s30 + $0x20] sm:$0xff]   ;;  %v2290_v17 = vld [vmem:[%s301_s30 + $0x28] sm:$0xff]  }
  0x12   : > { %446 = vmatpush1.bf16.msra.mxu0 %v2281_v4  ;;  %v2291_v18 = vld [vmem:[%s301_s30 + $0x30] sm:$0xff]   ;;  %v2292_v19 = vld [vmem:[%s301_s30 + $0x38] sm:$0xff]   ;;  %v2299_v22 = vld [vmem:[%s3167_s2 + $0x8] sm:$0xff]  }
  0x13   : > { %447 = vmatprep.subr.bf16.mxu0 %v2282_v5  ;;  %2142 = vmatpush3.bf16.msra.mxu1 %v2294_v8  ;;  %v2300_v23 = vld [vmem:[%s3167_s2] sm:$0xff]  }
  0x14   : > { %2143 = vmatprep.subr.bf16.mxu1 %v2295_v10 }
  0x16   : > { %448 = vmatpush1.bf16.msra.mxu0 %v2284_v9 }
  0x17   : > { %2144 = vmatpush3.bf16.msra.mxu1 %v2295_v10 }
  0x18   : > { %2145 = vmatprep.subr.bf16.mxu1 %v2296_v12 }
  0x19   : > { %1964 = vmatmul.mubr.msk.bf16.vlgmr.msra.gmra.mxu0 %vm401_vm1, %v2285_v11 }
  0x1a   : > { %475 = vmatprep.mubr.bf16.mxu0 %v2449_v6 }
  0x1b   : > { %2146 = vmatpush3.bf16.msra.mxu1 %v2296_v12 }
  0x1c   : > { %2147 = vmatprep.subr.bf16.mxu1 %v2297_v20 }
  0x1f   : > { %2148 = vmatpush3.bf16.msra.mxu1 %v2297_v20  ;;  %v2611_v20 = vld [vmem:[%s3169_s4 + $0x10] sm:$0xff]  }
  0x20   : > { %2149 = vmatprep.subr.bf16.mxu1 %v2298_v21 }
  0x21   : > { %1965 = vmatmul.mubr.msk.bf16.gmra.mxu0 %vm401_vm1, %v2286_v13 }
  0x22   : > { %485 = vmatprep.mubr.bf16.mxu0 %v2449_v6 }
  0x23   : > { %2150 = vmatpush3.bf16.msra.mxu1 %v2298_v21 }
  0x24   : > { %2151 = vmatprep.subr.bf16.mxu1 %v2299_v22 }
  0x27   : > { %2152 = vmatpush3.bf16.msra.mxu1 %v2299_v22 }
  0x28   : > { %2153 = vmatprep.subr.bf16.mxu1 %v2300_v23 }
  0x29   : > { %1966 = vmatmul.mubr.msk.bf16.gmra.mxu0 %vm401_vm1, %v2287_v14 }
  0x2a   : > { %495 = vmatprep.mubr.bf16.mxu0 %v2449_v6 }
  0x2b   : > { %2154 = vmatpush3.bf16.msra.mxu1 %v2300_v23  ;;  %v843_v23 = vlaneseq }
  0x31   : > { %1967 = vmatmul.mubr.msk.bf16.gmra.mxu0 %vm401_vm1, %v2288_v15  ;;  %v2301_v15 = vld [vmem:[%s3168_s3 + $0x18] sm:$0xff]  }
  0x32   : > { %505 = vmatprep.mubr.bf16.mxu0 %v2449_v6  ;;  %2171 = vmatprep.subr.bf16.mxu1 %v2301_v15 }
  0x39   : > { %1968 = vmatmul.mubr.msk.bf16.gmra.mxu0 %vm401_vm1, %v2289_v16  ;;  %v2302_v16 = vld [vmem:[%s3168_s3 + $0x10] sm:$0xff]  }
  0x3a   : > { %515 = vmatprep.mubr.bf16.mxu0 %v2449_v6 }
  0x41   : > { %1969 = vmatmul.mubr.msk.bf16.gmra.mxu0 %vm401_vm1, %v2290_v17  ;;  %v2303_v17 = vld [vmem:[%s3168_s3 + $0x8] sm:$0xff]  }
  0x42   : > { %525 = vmatprep.mubr.bf16.mxu0 %v2449_v6 }
  0x49   : > { %1970 = vmatmul.mubr.msk.bf16.gmra.mxu0 %vm401_vm1, %v2291_v18  ;;  %v2304_v18 = vld [vmem:[%s3168_s3] sm:$0xff]  }
  0x4a   : > { %535 = vmatprep.mubr.bf16.mxu0 %v2449_v6 }
  0x51   : > { %1971 = vmatmul.mubr.msk.bf16.gmra.mxu0 %vm401_vm1, %v2292_v19  ;;  %v2606_v19 = vld [vmem:[%s3169_s4 + $0x18] sm:$0xff]  }
  0x52   : > { %2195 = vmatprep.subr.bf16.mxu0 %v2606_v19 }
  0x53   : > { %2196 = vmatpush3.bf16.msra.mxu0 %v2606_v19 }
  0x54   : > { %2197 = vmatprep.subr.bf16.mxu0 %v2611_v20 }
  0x57   : > { %2198 = vmatpush3.bf16.msra.mxu0 %v2611_v20 }
  0xd9   : > { %v467_v24 = vpop.f32.mrf.mxu0 }
  0xda   : > { %v546_v27 = vmul.f32 %v467_v24, %v467_v24 }
  0xdb   : > { %v2561_v25 = vpop.f32.mrf.mxu0 }
  0xdd   : > { %v471_v26 = vpop.f32.mrf.mxu0 }
  0xde   : > { %v547_v28 = vmul.f32 %v471_v26, %v471_v26 }
  0xdf   : > { %v2563_v29 = vpop.f32.mrf.mxu0 }
  0xe0   : > { %v562_v30 = vpack.c.bf16 %v547_v28, %v546_v27  ;;  %v2618_v27 = vshrl.u32 %v843_v23, 7 }
  0xe1   : > { %v477_v31 = vpop.f32.mrf.mxu0 }
  0xe2   : > { %2155 = vmatprep.mubr.bf16.mxu1 %v562_v30  ;;  %v548_v34 = vmul.f32 %v477_v31, %v477_v31  ;;  %v845_v28 = vsub.s32 1, %v2618_v27  ;;  %v2624_v30 = vld [vmem:[%s3171_s6] sm:$0xff]  ;;  %v881_v31 = vsub.s32 0, %v2618_v27 }
  0xe3   : > { %v2565_v32 = vpop.f32.mrf.mxu0 }
  0xe5   : > { %v481_v33 = vpop.f32.mrf.mxu0 }
  0xe6   : > { %v549_v35 = vmul.f32 %v481_v33, %v481_v33 }
  0xe7   : > { %v2567_v36 = vpop.f32.mrf.mxu0 }
  0xe8   : > { %v563_v37 = vpack.c.bf16 %v549_v35, %v548_v34  ;;  %v2628_v35 = vrot.slane %v2624_v30, %v845_v28 }
  0xe9   : > { %v487_v38 = vpop.f32.mrf.mxu0 }
  0xea   : > { %2156 = vmatmul.mubr.bf16.vlgmr.msra.gmra.mxu1 %v563_v37  ;;  %v550_v41 = vmul.f32 %v487_v38, %v487_v38 }
  0xeb   : > { %v2569_v39 = vpop.f32.mrf.mxu0  ;;  %2172 = vmatpush3.bf16.msra.mxu1 %v2301_v15 }
  0xec   : > { %2173 = vmatprep.subr.bf16.mxu1 %v2302_v16 }
  0xed   : > { %v491_v40 = vpop.f32.mrf.mxu0 }
  0xee   : > { %v551_v42 = vmul.f32 %v491_v40, %v491_v40  ;;  %v2631_v40 = vrot.slane %v2624_v30, %v881_v31 }
  0xef   : > { %v2571_v43 = vpop.f32.mrf.mxu0  ;;  %2174 = vmatpush3.bf16.msra.mxu1 %v2302_v16 }
  0xf0   : > { %v564_v44 = vpack.c.bf16 %v551_v42, %v550_v41  ;;  %2175 = vmatprep.subr.bf16.mxu1 %v2303_v17 }
  0xf1   : > { %v497_v45 = vpop.f32.mrf.mxu0 }
  0xf2   : > { %2159 = vmatprep.mubr.bf16.mxu1 %v564_v44  ;;  %v552_v48 = vmul.f32 %v497_v45, %v497_v45 }
  0xf3   : > { %v2573_v46 = vpop.f32.mrf.mxu0  ;;  %2176 = vmatpush3.bf16.msra.mxu1 %v2303_v17 }
  0xf4   : > { %2177 = vmatprep.subr.bf16.mxu1 %v2304_v18 }
  0xf5   : > { %v501_v47 = vpop.f32.mrf.mxu0 }
  0xf6   : > { %v553_v49 = vmul.f32 %v501_v47, %v501_v47 }
  0xf7   : > { %v2575_v50 = vpop.f32.mrf.mxu0  ;;  %2178 = vmatpush3.bf16.msra.mxu1 %v2304_v18 }
  0xf8   : > { %v565_v51 = vpack.c.bf16 %v553_v49, %v552_v48  ;;  %2219 = vmatprep.subr.bf16.mxu1 %v2606_v19 }
  0xf9   : > { %v507_v52 = vpop.f32.mrf.mxu0 }
  0xfa   : > { %2160 = vmatmul.mubr.bf16.gmra.mxu1 %v565_v51  ;;  %v554_v55 = vmul.f32 %v507_v52, %v507_v52 }
  0xfb   : > { %v2577_v53 = vpop.f32.mrf.mxu0 }
  0xfd   : > { %v511_v54 = vpop.f32.mrf.mxu0 }
  0xfe   : > { %v555_v56 = vmul.f32 %v511_v54, %v511_v54 }
  0xff   : > { %v2579_v57 = vpop.f32.mrf.mxu0 }
 0x100   : > { %v566_v58 = vpack.c.bf16 %v555_v56, %v554_v55 }
 0x101   : > { %v517_v59 = vpop.f32.mrf.mxu0 }
 0x102   : > { %2163 = vmatprep.mubr.bf16.mxu1 %v566_v58  ;;  %v556_v62 = vmul.f32 %v517_v59, %v517_v59 }
 0x103   : > { %v2581_v60 = vpop.f32.mrf.mxu0 }
 0x105   : > { %v521_v61 = vpop.f32.mrf.mxu0 }
 0x106   : > { %v557_v63 = vmul.f32 %v521_v61, %v521_v61 }
 0x107   : > { %v2583_v0 = vpop.f32.mrf.mxu0 }
 0x108   : > { %v567_v1 = vpack.c.bf16 %v557_v63, %v556_v62 }
 0x109   : > { %v527_v2 = vpop.f32.mrf.mxu0 }
 0x10a   : > { %2164 = vmatmul.mubr.bf16.gmra.mxu1 %v567_v1  ;;  %v558_v5 = vmul.f32 %v527_v2, %v527_v2 }
 0x10b   : > { %v2585_v3 = vpop.f32.mrf.mxu0 }
 0x10d   : > { %v531_v4 = vpop.f32.mrf.mxu0 }
 0x10e   : > { %v559_v6 = vmul.f32 %v531_v4, %v531_v4 }
 0x10f   : > { %v2587_v7 = vpop.f32.mrf.mxu0 }
 0x110   : > { %v568_v8 = vpack.c.bf16 %v559_v6, %v558_v5 }
 0x111   : > { %v537_v9 = vpop.f32.mrf.mxu0 }
 0x112   : > { %2167 = vmatprep.mubr.bf16.mxu1 %v568_v8  ;;  %v560_v12 = vmul.f32 %v537_v9, %v537_v9 }
 0x113   : > { %v2589_v10 = vpop.f32.mrf.mxu0 }
 0x115   : > { %v541_v11 = vpop.f32.mrf.mxu0 }
 0x116   : > { %v561_v13 = vmul.f32 %v541_v11, %v541_v11 }
 0x118   : > { %v569_v14 = vpack.c.bf16 %v561_v13, %v560_v12 }
 0x11a   : > { %2168 = vmatmul.mubr.bf16.gmra.mxu1 %v569_v14 }
 0x1aa   : > { %v2157_v21 = vpop.f32.mrf.mxu1 }
 0x1ab   : > { %2313 = vrsqrt.f32 %v2157_v21  ;;  %vm747_vm2 = vcmp.eq.f32.partialorder %v2157_v21, inf  ;;  %v750_v38 = vand.u32 2147483648, %v2157_v21  ;;  %vm749_vm3 = vcmp.eq.f32.partialorder %v2157_v21, 0.0 }
 0x1ac   : > { %v668_v22 = vpop.f32.mrf.mxu1 }
 0x1ad   : > { %2315 = vrsqrt.f32 %v668_v22  ;;  %vm733_vm4 = vcmp.eq.f32.partialorder %v668_v22, inf  ;;  %vm735_vm5 = vcmp.eq.f32.partialorder %v668_v22, 0.0  ;;  %v736_v48 = vand.u32 2147483648, %v668_v22 }
 0x1ae   : > { %v2158_v24 = vpop.f32.mrf.mxu1 }
 0x1af   : > { %2317 = vrsqrt.f32 %v2158_v24  ;;  %vm754_vm6 = vcmp.eq.f32.partialorder %v2158_v24, inf  ;;  %vm756_vm7 = vcmp.eq.f32.partialorder %v2158_v24, 0.0  ;;  %v757_v58 = vand.u32 2147483648, %v2158_v24 }
 0x1b0   : > { %v671_v26 = vpop.f32.mrf.mxu1 }
 0x1b1   : > { %2319 = vrsqrt.f32 %v671_v26  ;;  %vm740_vm8 = vcmp.eq.f32.partialorder %v671_v26, inf  ;;  %v743_v4 = vand.u32 2147483648, %v671_v26  ;;  %vm742_vm9 = vcmp.eq.f32.partialorder %v671_v26, 0.0 }
 0x1b8   : > { %v2314_v33 = vpop.eup %2313 }
 0x1b9   : > { %v746_v34 = vmul.f32 %v2314_v33, %v2157_v21 }
 0x1ba   : > { %v2316_v37 = vpop.eup %2315  ;;  %v2161_v41 = vpop.f32.mrf.mxu1 }
 0x1bb   : > { %v748_v42 = vsel %vm747_vm2, %v2157_v21, %v746_v34  ;;  %v732_v44 = vmul.f32 %v2316_v37, %v668_v22  ;;  %2321 = vrsqrt.f32 %v2161_v41  ;;  %vm775_vm10 = vcmp.eq.f32.partialorder %v2161_v41, inf }
 0x1bc   : > { %v2318_v45 = vpop.eup %2317  ;;  %v751_v47 = vsel %vm749_vm3, %v750_v38, %v748_v42  ;;  %v684_v49 = vpop.f32.mrf.mxu1  ;;  %vm777_vm11 = vcmp.eq.f32.partialorder %v2161_v41, 0.0 }
 0x1bd   : > { %v849_v51 = vmul.f32 %v2628_v35, %v751_v47  ;;  %v734_v52 = vsel %vm733_vm4, %v668_v22, %v732_v44  ;;  %v753_v54 = vmul.f32 %v2318_v45, %v2158_v24  ;;  %2323 = vrsqrt.f32 %v684_v49 }
 0x1be   : > { %v2320_v55 = vpop.eup %2319  ;;  %v737_v56 = vsel %vm735_vm5, %v736_v48, %v734_v52  ;;  %v2634_v59 = vpop.f32.mrf.mxu1  ;;  %vm761_vm12 = vcmp.eq.f32.partialorder %v684_v49, inf  ;;  %v764_v34 = vand.u32 2147483648, %v684_v49  ;;  %vm763_vm13 = vcmp.eq.f32.partialorder %v684_v49, 0.0 }
 0x1bf   : > { %v865_v61 = vadd.f32 %v849_v51, %v2565_v32  ;;  %v755_v62 = vsel %vm754_vm6, %v2158_v24, %v753_v54  ;;  %v739_v63 = vmul.f32 %v2320_v55, %v671_v26  ;;  %v847_v1 = vmul.f32 %v2628_v35, %v737_v56 }
 0x1c0   : > { %v758_v2 = vsel %vm756_vm7, %v757_v58, %v755_v62  ;;  %2325 = vrsqrt.f32 %v2634_v59  ;;  %v2639_v5 = vpop.f32.mrf.mxu1  ;;  %vm782_vm14 = vcmp.eq.f32.partialorder %v2634_v59, inf  ;;  %v785_v52 = vand.u32 2147483648, %v2634_v59 }
 0x1c1   : > { %v2642_v6 = vadd.f32 %v2631_v40, %v865_v61  ;;  %v850_v8 = vmul.f32 %v2628_v35, %v758_v2  ;;  %v741_v9 = vsel %vm740_vm8, %v671_v26, %v739_v63  ;;  %2327 = vrsqrt.f32 %v2639_v5 }
 0x1c2   : > { %v744_v11 = vsel %vm742_vm9, %v743_v4, %v741_v9  ;;  %v863_v14 = vadd.f32 %v847_v1, %v2561_v25  ;;  %v778_v26 = vand.u32 2147483648, %v2161_v41  ;;  %vm784_vm15 = vcmp.eq.f32.partialorder %v2634_v59, 0.0 }
 0x1c3   : > { %v1982_v32 = vmul.f32 -1.442695, %v2642_v6  ;;  %v866_v12 = vadd.f32 %v850_v8, %v2567_v36  ;;  %v848_v13 = vmul.f32 %v2628_v35, %v744_v11  ;;  %vm768_vm0 = vcmp.eq.f32.partialorder %v2639_v5, inf }
 0x1c4   : > { %v2655_v17 = vadd.f32 %v2631_v40, %v863_v14  ;;  %v771_v61 = vand.u32 2147483648, %v2639_v5  ;;  %vm770_vm1 = vcmp.eq.f32.partialorder %v2639_v5, 0.0 }
 0x1c5   : > { %2329 = vpow2.f32 %v1982_v32  ;;  %v2651_v15 = vadd.f32 %v2631_v40, %v866_v12  ;;  %v864_v16 = vadd.f32 %v848_v13, %v2563_v29 }
 0x1c6   : > { %v1980_v36 = vmul.f32 -1.442695, %v2655_v17 }
 0x1c7   : > { %v1983_v18 = vmul.f32 -1.442695, %v2651_v15  ;;  %v2659_v21 = vadd.f32 %v2631_v40, %v864_v16 }
 0x1c8   : > { %v2322_v22 = vpop.eup %2321 }
 0x1c9   : > { %2331 = vpow2.f32 %v1983_v18  ;;  %v774_v23 = vmul.f32 %v2322_v22, %v2161_v41  ;;  %v1981_v25 = vmul.f32 -1.442695, %v2659_v21 }
 0x1ca   : > { %v2324_v24 = vpop.eup %2323  ;;  %v2663_v28 = vpop.f32.mrf.mxu1  ;;  %2333 = vpow2.f32 %v1980_v36 }
 0x1cb   : > { %v776_v29 = vsel %vm775_vm10, %v2161_v41, %v774_v23  ;;  %v760_v31 = vmul.f32 %v2324_v24, %v684_v49  ;;  %2335 = vrsqrt.f32 %v2663_v28  ;;  %vm803_vm2 = vcmp.eq.f32.partialorder %v2663_v28, inf }
 0x1cc   : > { %v779_v33 = vsel %vm777_vm11, %v778_v26, %v776_v29  ;;  %v2666_v37 = vpop.f32.mrf.mxu1  ;;  %2337 = vpow2.f32 %v1981_v25  ;;  %vm805_vm3 = vcmp.eq.f32.partialorder %v2663_v28, 0.0  ;;  %vm1055_vm11 = vcmask 523264  }
 0x1cd   : > { %v2326_v38 = vpop.eup %2325  ;;  %v853_v42 = vmul.f32 %v2628_v35, %v779_v33  ;;  %v762_v44 = vsel %vm761_vm12, %v684_v49, %v760_v31  ;;  %2339 = vrsqrt.f32 %v2666_v37  ;;  %vm789_vm4 = vcmp.eq.f32.partialorder %v2666_v37, inf }
 0x1ce   : > { %v765_v45 = vsel %vm763_vm13, %v764_v34, %v762_v44  ;;  %v781_v47 = vmul.f32 %v2326_v38, %v2634_v59  ;;  %v2671_v41 = vpop.f32.mrf.mxu1  ;;  %v2328_v48 = vpop.eup %2327  ;;  %vm791_vm5 = vcmp.eq.f32.partialorder %v2666_v37, 0.0  ;;  %v792_v34 = vand.u32 2147483648, %v2666_v37 }
 0x1cf   : > { %v851_v51 = vmul.f32 %v2628_v35, %v765_v45  ;;  %2341 = vrsqrt.f32 %v2671_v41  ;;  %v767_v49 = vmul.f32 %v2328_v48, %v2639_v5  ;;  %v869_v56 = vadd.f32 %v853_v42, %v2573_v46 }
 0x1d0   : > { %v783_v54 = vsel %vm782_vm14, %v2634_v59, %v781_v47  ;;  %v2680_v55 = vpop.f32.mrf.mxu1  ;;  %vm810_vm6 = vcmp.eq.f32.partialorder %v2671_v41, inf  ;;  %vm812_vm7 = vcmp.eq.f32.partialorder %v2671_v41, 0.0 }
 0x1d1   : > { %v786_v58 = vsel %vm784_vm15, %v785_v52, %v783_v54  ;;  %2343 = vrsqrt.f32 %v2680_v55  ;;  %v769_v1 = vsel %vm768_vm0, %v2639_v5, %v767_v49  ;;  %v867_v59 = vadd.f32 %v851_v51, %v2569_v39 }
 0x1d2   : > { %v2330_v62 = vpop.eup %2329  ;;  %v854_v63 = vmul.f32 %v2628_v35, %v786_v58  ;;  %v772_v4 = vsel %vm770_vm1, %v771_v61, %v769_v1  ;;  %v2691_v46 = vadd.f32 %v2631_v40, %v869_v56  ;;  %v813_v51 = vand.u32 2147483648, %v2671_v41 }
 0x1d3   : > { %v949_v2 = vadd.f32 1.0, %v2330_v62  ;;  %v852_v8 = vmul.f32 %v2628_v35, %v772_v4  ;;  %v2695_v9 = vadd.f32 %v2631_v40, %v867_v59  ;;  %vm796_vm8 = vcmp.eq.f32.partialorder %v2680_v55, inf }
 0x1d4   : > { %v1986_v11 = vmul.f32 -1.442695, %v2691_v46  ;;  %v870_v39 = vadd.f32 %v854_v63, %v2575_v50  ;;  %v799_v62 = vand.u32 2147483648, %v2680_v55  ;;  %vm798_vm9 = vcmp.eq.f32.partialorder %v2680_v55, 0.0 }
 0x1d5   : > { %2345 = vrcp.f32 %v949_v2  ;;  %v868_v12 = vadd.f32 %v852_v8, %v2571_v43  ;;  %v1984_v5 = vmul.f32 -1.442695, %v2695_v9  ;;  %v806_v43 = vand.u32 2147483648, %v2663_v28 }
 0x1d6   : > { %v2332_v32 = vpop.eup %2331  ;;  %2347 = vpow2.f32 %v1986_v11  ;;  %v2712_v26 = vadd.f32 %v2631_v40, %v870_v39 }
 0x1d7   : > { %v2334_v13 = vpop.eup %2333  ;;  %v950_v14 = vadd.f32 1.0, %v2332_v32  ;;  %2349 = vpow2.f32 %v1984_v5  ;;  %v2709_v24 = vadd.f32 %v2631_v40, %v868_v12 }
 0x1d8   : > { %v2336_v16 = vpop.eup %2335  ;;  %v947_v18 = vadd.f32 1.0, %v2334_v13  ;;  %v1987_v49 = vmul.f32 -1.442695, %v2712_v26 }
 0x1d9   : > { %v2338_v22 = vpop.eup %2337  ;;  %2351 = vrcp.f32 %v950_v14  ;;  %v802_v36 = vmul.f32 %v2336_v16, %v2663_v28  ;;  %v1985_v54 = vmul.f32 -1.442695, %v2709_v24 }
 0x1da   : > { %v2340_v23 = vpop.eup %2339  ;;  %v2706_v50 = vpop.f32.mrf.mxu1  ;;  %v948_v25 = vadd.f32 1.0, %v2338_v22  ;;  %2353 = vrcp.f32 %v947_v18 }
 0x1db   : > { %v804_v29 = vsel %vm803_vm2, %v2663_v28, %v802_v36  ;;  %v788_v31 = vmul.f32 %v2340_v23, %v2666_v37  ;;  %2355 = vrsqrt.f32 %v2706_v50  ;;  %vm831_vm10 = vcmp.eq.f32.partialorder %v2706_v50, inf }
 0x1dc   : > { %v2342_v33 = vpop.eup %2341  ;;  %v2721_v38 = vpop.f32.mrf.mxu1  ;;  %2357 = vrcp.f32 %v948_v25  ;;  %v807_v42 = vsel %vm805_vm3, %v806_v43, %v804_v29  ;;  %vm833_vm12 = vcmp.eq.f32.partialorder %v2706_v50, 0.0  ;;  %vm1867_vm3 = vcmask 257024  }
 0x1dd   : > { %v790_v44 = vsel %vm789_vm4, %v2666_v37, %v788_v31  ;;  %v809_v45 = vmul.f32 %v2342_v33, %v2671_v41  ;;  %2359 = vrsqrt.f32 %v2721_v38  ;;  %v857_v58 = vmul.f32 %v2628_v35, %v807_v42 }
 0x1de   : > { %v2344_v47 = vpop.eup %2343  ;;  %v793_v48 = vsel %vm791_vm5, %v792_v34, %v790_v44  ;;  %v2731_v52 = vpop.f32.mrf.mxu1  ;;  %vm817_vm13 = vcmp.eq.f32.partialorder %v2721_v38, inf  ;;  %vm819_vm14 = vcmp.eq.f32.partialorder %v2721_v38, 0.0  ;;  %v820_v16 = vand.u32 2147483648, %v2721_v38 }
 0x1df   : > { %v855_v28 = vmul.f32 %v2628_v35, %v793_v48  ;;  %v811_v56 = vsel %vm810_vm6, %v2671_v41, %v809_v45  ;;  %v795_v37 = vmul.f32 %v2344_v47, %v2680_v55  ;;  %2361 = vrsqrt.f32 %v2731_v52 }
 0x1e0   : > { %v814_v61 = vsel %vm812_vm7, %v813_v51, %v811_v56  ;;  %v2744_v63 = vpop.f32.mrf.mxu1  ;;  %v873_v32 = vadd.f32 %v857_v58, %v2581_v60  ;;  %vm838_vm15 = vcmp.eq.f32.partialorder %v2731_v52, inf  ;;  %vm840_vm0 = vcmp.eq.f32.partialorder %v2731_v52, 0.0 }
 0x1e1   : > { %v858_v1 = vmul.f32 %v2628_v35, %v814_v61  ;;  %v797_v59 = vsel %vm796_vm8, %v2680_v55, %v795_v37  ;;  %2363 = vrsqrt.f32 %v2744_v63  ;;  %v871_v8 = vadd.f32 %v855_v28, %v2577_v53 }
 0x1e2   : > { %v800_v2 = vsel %vm798_vm9, %v799_v62, %v797_v59  ;;  %2365 = vpow2.f32 %v1985_v54  ;;  %v2346_v4 = vpop.eup %2345  ;;  %v834_v55 = vand.u32 2147483648, %v2706_v50  ;;  %v2764_v53 = vadd.f32 %v2631_v40, %v873_v32 }
 0x1e3   : > { %v856_v41 = vmul.f32 %v2628_v35, %v800_v2  ;;  %2367 = vpow2.f32 %v1987_v49  ;;  %v2348_v11 = vpop.eup %2347  ;;  %v874_v12 = vadd.f32 %v858_v1, %v2583_v0  ;;  %v2759_v13 = vadd.f32 %v2631_v40, %v871_v8 }
 0x1e4   : > { %v2350_v5 = vpop.eup %2349  ;;  %v841_v36 = vand.u32 2147483648, %v2731_v52  ;;  %v1990_v43 = vmul.f32 -1.442695, %v2764_v53  ;;  %v953_v45 = vadd.f32 1.0, %v2348_v11  ;;  %v997_v51 = vmul.f32 %v2346_v4, %v2642_v6 }
 0x1e5   : > { %v872_v39 = vadd.f32 %v856_v41, %v2579_v57  ;;  %v2767_v60 = vadd.f32 %v2631_v40, %v874_v12  ;;  %v1988_v18 = vmul.f32 -1.442695, %v2759_v13  ;;  %v951_v28 = vadd.f32 1.0, %v2350_v5 }
 0x1e6   : > { %v2352_v14 = vpop.eup %2351  ;;  %vm824_vm1 = vcmp.eq.f32.partialorder %v2744_v63, inf  ;;  %vm826_vm2 = vcmp.eq.f32.partialorder %v2744_v63, 0.0  ;;  %v827_v4 = vand.u32 2147483648, %v2744_v63 }
 0x1e7   : > { %v2354_v0 = vpop.eup %2353  ;;  %v2772_v57 = vadd.f32 %v2631_v40, %v872_v39  ;;  %v1991_v23 = vmul.f32 -1.442695, %v2767_v60  ;;  %v998_v31 = vmul.f32 %v2352_v14, %v2651_v15  ;;  %2369 = vpow2.f32 %v1988_v18 }
 0x1e8   : > { %v2356_v22 = vpop.eup %2355  ;;  %v995_v42 = vmul.f32 %v2354_v0, %v2655_v17  ;;  %2371 = vpow2.f32 %v1990_v43 }
 0x1e9   : > { %v2358_v25 = vpop.eup %2357  ;;  %v830_v29 = vmul.f32 %v2356_v22, %v2706_v50  ;;  %v1989_v33 = vmul.f32 -1.442695, %v2772_v57  ;;  %v1012_v37 = vpack.c.bf16 %v998_v31, %v997_v51 }
 0x1ea   : > { %v2360_v34 = vpop.eup %2359  ;;  %v996_v44 = vmul.f32 %v2358_v25, %v2659_v21 }
 0x1eb   : > { %v832_v47 = vsel %vm831_vm10, %v2706_v50, %v830_v29  ;;  %v816_v48 = vmul.f32 %v2360_v34, %v2721_v38  ;;  %2373 = vpow2.f32 %v1989_v33 }
 0x1ec   : > { %v2362_v15 = vpop.eup %2361  ;;  %v835_v54 = vsel %vm833_vm12, %v834_v55, %v832_v47  ;;  %v1011_v49 = vpack.c.bf16 %v996_v44, %v995_v42  ;;  %2375 = vpow2.f32 %v1991_v23 }
 0x1ed   : > { %v861_v17 = vmul.f32 %v2628_v35, %v835_v54  ;;  %v818_v21 = vsel %vm817_vm13, %v2721_v38, %v816_v48  ;;  %v837_v56 = vmul.f32 %v2362_v15, %v2731_v52  ;;  %2377 = vrcp.f32 %v953_v45 }
 0x1ee   : > { %v2364_v58 = vpop.eup %2363  ;;  %v821_v6 = vsel %vm819_vm14, %v820_v16, %v818_v21  ;;  %2179 = vmatprep.mubr.msk.bf16.mxu1 %vm1055_vm11, %v1011_v49  ;;  %2379 = vrcp.f32 %v951_v28 }
 0x1ef   : > { %v2366_v50 = vpop.eup %2365  ;;  %v859_v61 = vmul.f32 %v2628_v35, %v821_v6  ;;  %v839_v62 = vsel %vm838_vm15, %v2731_v52, %v837_v56  ;;  %v823_v1 = vmul.f32 %v2364_v58, %v2744_v63  ;;  %2180 = vmatmul.mubr.msk.bf16.vlgmr.msra.gmra.mxu1 %vm1055_vm11, %v1012_v37  ;;  %v877_v38 = vadd.f32 %v861_v17, %v2589_v10  ;;  %v543_v10 = vpop.f32.mrf.mxu0 }
 0x1f0   : > { %v2368_v59 = vpop.eup %2367  ;;  %v842_v2 = vsel %vm840_vm0, %v841_v36, %v839_v62  ;;  %v952_v41 = vadd.f32 1.0, %v2366_v50  ;;  %2220 = vmatpush3.bf16.msra.mxu1 %v2606_v19 }
 0x1f1   : > { %v862_v8 = vmul.f32 %v2628_v35, %v842_v2  ;;  %v825_v11 = vsel %vm824_vm1, %v2744_v63, %v823_v1  ;;  %v954_v32 = vadd.f32 1.0, %v2368_v59  ;;  %v875_v12 = vadd.f32 %v859_v61, %v2585_v3  ;;  %2221 = vmatprep.subr.bf16.mxu1 %v2611_v20 }
 0x1f2   : > { %v828_v52 = vsel %vm826_vm2, %v827_v4, %v825_v11  ;;  %2381 = vrcp.f32 %v952_v41  ;;  %v2821_v5 = vadd.f32 %v2631_v40, %v877_v38  ;;  %v2307_v11 = vld [vmem:[%s3169_s4 + $0x8] sm:$0xff]  }
 0x1f3   : > { %v860_v19 = vmul.f32 %v2628_v35, %v828_v52  ;;  %2383 = vrcp.f32 %v954_v32  ;;  %v2825_v55 = vadd.f32 %v2631_v40, %v875_v12  ;;  %v878_v39 = vadd.f32 %v862_v8, %v543_v10  ;;  %2199 = vmatprep.subr.bf16.mxu0 %v2307_v11  ;;  %v2308_v32 = vld [vmem:[%s3169_s4] sm:$0xff]  }
 0x1f4   : > { %v1994_v14 = vmul.f32 -1.442695, %v2821_v5  ;;  %2222 = vmatpush3.bf16.msra.mxu1 %v2611_v20  ;;  %v2370_v0 = vpop.eup %2369  ;;  %2200 = vmatpush3.bf16.msra.mxu0 %v2307_v11  ;;  %v1029_v12 = vsub.s32 2, %v2618_v27 }
 0x1f5   : > { %v876_v3 = vadd.f32 %v860_v19, %v2587_v7  ;;  %v1992_v63 = vmul.f32 -1.442695, %v2825_v55  ;;  %v898_v16 = vadd.f32 %v2631_v40, %v878_v39  ;;  %v2372_v18 = vpop.eup %2371  ;;  %v955_v22 = vadd.f32 1.0, %v2370_v0  ;;  %2223 = vmatprep.subr.bf16.mxu1 %v2307_v11  ;;  %2201 = vmatprep.subr.bf16.mxu0 %v2308_v32 }
 0x1f6   : > { %v957_v43 = vadd.f32 1.0, %v2372_v18  ;;  %v2857_v52 = vrot.slane %v2624_v30, %v1029_v12 }
 0x1f7   : > { %v896_v35 = vadd.f32 %v2631_v40, %v876_v3  ;;  %2385 = vpow2.f32 %v1992_v63  ;;  %v1995_v7 = vmul.f32 -1.442695, %v898_v16 }
 0x1f8   : > { %v2374_v36 = vpop.eup %2373  ;;  %2387 = vpow2.f32 %v1994_v14  ;;  %2224 = vmatpush3.bf16.msra.mxu1 %v2307_v11  ;;  %2202 = vmatpush3.bf16.msra.mxu0 %v2308_v32 }
 0x1f9   : > { %v2376_v23 = vpop.eup %2375  ;;  %v956_v25 = vadd.f32 1.0, %v2374_v36  ;;  %2389 = vrcp.f32 %v955_v22  ;;  %v1993_v29 = vmul.f32 -1.442695, %v896_v35  ;;  %2225 = vmatprep.subr.bf16.mxu1 %v2308_v32 }
 0x1fa   : > { %v958_v20 = vadd.f32 1.0, %v2376_v23  ;;  %2391 = vrcp.f32 %v957_v43  ;;  %v2378_v31 = vpop.eup %2377 }
 0x1fb   : > { %2393 = vrcp.f32 %v956_v25  ;;  %v2380_v33 = vpop.eup %2379  ;;  %v1001_v45 = vmul.f32 %v2378_v31, %v2691_v46 }
 0x1fc   : > { %2395 = vrcp.f32 %v958_v20  ;;  %v999_v40 = vmul.f32 %v2380_v33, %v2695_v9  ;;  %2226 = vmatpush3.bf16.msra.mxu1 %v2308_v32 }
 0x1fd   : > { %2397 = vpow2.f32 %v1993_v29 }
 0x1fe   : > { %2399 = vpow2.f32 %v1995_v7 }
 0x1ff   : > { %v2382_v34 = vpop.eup %2381 }
 0x200   : > { %v2384_v42 = vpop.eup %2383  ;;  %v1000_v44 = vmul.f32 %v2382_v34, %v2709_v24 }
 0x201   : > { %v1002_v47 = vmul.f32 %v2384_v42, %v2712_v26 }
 0x202   : > { %v1013_v48 = vpack.c.bf16 %v1000_v44, %v999_v40 }
 0x203   : > { %v1014_v51 = vpack.c.bf16 %v1002_v47, %v1001_v45 }
 0x204   : > { %v2386_v15 = vpop.eup %2385  ;;  %2183 = vmatprep.mubr.msk.bf16.mxu1 %vm1055_vm11, %v1013_v48 }
 0x205   : > { %v2388_v54 = vpop.eup %2387  ;;  %2184 = vmatmul.mubr.msk.bf16.gmra.mxu1 %vm1055_vm11, %v1014_v51  ;;  %v959_v17 = vadd.f32 1.0, %v2386_v15 }
 0x206   : > { %v2390_v49 = vpop.eup %2389  ;;  %v961_v56 = vadd.f32 1.0, %v2388_v54 }
 0x207   : > { %v2392_v28 = vpop.eup %2391  ;;  %v1003_v24 = vmul.f32 %v2390_v49, %v2759_v13  ;;  %2401 = vrcp.f32 %v959_v17 }
 0x208   : > { %v2394_v21 = vpop.eup %2393  ;;  %v1005_v26 = vmul.f32 %v2392_v28, %v2764_v53  ;;  %2403 = vrcp.f32 %v961_v56 }
 0x209   : > { %v2396_v9 = vpop.eup %2395  ;;  %v1004_v46 = vmul.f32 %v2394_v21, %v2772_v57 }
 0x20a   : > { %v2398_v37 = vpop.eup %2397  ;;  %v1006_v58 = vmul.f32 %v2396_v9, %v2767_v60 }
 0x20b   : > { %v2400_v6 = vpop.eup %2399  ;;  %v1015_v50 = vpack.c.bf16 %v1004_v46, %v1003_v24  ;;  %v960_v61 = vadd.f32 1.0, %v2398_v37 }
 0x20c   : > { %v1016_v62 = vpack.c.bf16 %v1006_v58, %v1005_v26  ;;  %v962_v1 = vadd.f32 1.0, %v2400_v6 }
 0x20d   : > { %2187 = vmatprep.mubr.msk.bf16.mxu1 %vm1055_vm11, %v1015_v50  ;;  %2405 = vrcp.f32 %v960_v61 }
 0x20e   : > { %2188 = vmatmul.mubr.msk.bf16.gmra.mxu1 %vm1055_vm11, %v1016_v62  ;;  %2407 = vrcp.f32 %v962_v1 }
 0x214   : > { %v2402_v13 = vpop.eup %2401 }
 0x215   : > { %v2404_v57 = vpop.eup %2403  ;;  %v1007_v53 = vmul.f32 %v2402_v13, %v2825_v55 }
 0x216   : > { %v1009_v2 = vmul.f32 %v2404_v57, %v2821_v5 }
 0x21a   : > { %v2406_v38 = vpop.eup %2405 }
 0x21b   : > { %v2408_v59 = vpop.eup %2407  ;;  %v1008_v60 = vmul.f32 %v2406_v38, %v896_v35 }
 0x21c   : > { %v1010_v4 = vmul.f32 %v2408_v59, %v898_v16 }
 0x21d   : > { %v1017_v41 = vpack.c.bf16 %v1008_v60, %v1007_v53 }
 0x21e   : > { %v1018_v8 = vpack.c.bf16 %v1010_v4, %v1009_v2 }
 0x21f   : > { %2191 = vmatprep.mubr.msk.bf16.mxu1 %vm1055_vm11, %v1017_v41 }
 0x220   : > { %2192 = vmatmul.mubr.msk.bf16.gmra.mxu1 %vm1055_vm11, %v1018_v8 }
 0x2af   : > { %v2181_v10 = vpop.f32.mrf.mxu1 }
 0x2b0   : > { %v2866_v14 = vadd.f32 %v2181_v10, %v2857_v52 }
 0x2b1   : > { %v1114_v5 = vpop.f32.mrf.mxu1 }
 0x2b2   : > { %v2860_v55 = vadd.f32 %v1114_v5, %v2857_v52  ;;  %v1340_v35 = vmul.f32 %v2866_v14, %v2866_v14 }
 0x2b3   : > { %v2182_v19 = vpop.f32.mrf.mxu1 }
 0x2b4   : > { %v2863_v39 = vadd.f32 %v2182_v19, %v2857_v52  ;;  %v1338_v16 = vmul.f32 %v2860_v55, %v2860_v55  ;;  %v2309_v19 = vld [vmem:[%s3170_s5 + $0x18] sm:$0xff]  }
 0x2b5   : > { %v1117_v3 = vpop.f32.mrf.mxu1  ;;  %2243 = vmatprep.subr.bf16.mxu0 %v2309_v19 }
 0x2b6   : > { %v2869_v63 = vadd.f32 %v1117_v3, %v2857_v52  ;;  %v1341_v0 = vmul.f32 %v2863_v39, %v2863_v39  ;;  %v1178_v36 = vpack.c.bf16 %v2863_v39, %v2866_v14  ;;  %v2310_v3 = vld [vmem:[%s3170_s5 + $0x10] sm:$0xff]  }
 0x2b8   : > { %v1177_v18 = vpack.c.bf16 %v2869_v63, %v2860_v55  ;;  %v1339_v22 = vmul.f32 %v2869_v63, %v2869_v63  ;;  %v1355_v23 = vpack.c.bf16 %v1341_v0, %v1340_v35  ;;  %v2311_v0 = vld [vmem:[%s3170_s5 + $0x8] sm:$0xff]  }
 0x2ba   : > { %v1354_v43 = vpack.c.bf16 %v1339_v22, %v1338_v16  ;;  %2203 = vmatprep.mubr.msk.bf16.mxu0 %vm1055_vm11, %v1177_v18  ;;  %v2312_v16 = vld [vmem:[%s3170_s5] sm:$0xff]  }
 0x2bb   : > { %2204 = vmatmul.mubr.msk.bf16.vlgmr.msra.gmra.mxu0 %vm1055_vm11, %v1178_v36 }
 0x2bc   : > { %2227 = vmatprep.mubr.msk.bf16.mxu1 %vm1055_vm11, %v1354_v43  ;;  %2244 = vmatpush3.bf16.msra.mxu0 %v2309_v19 }
 0x2bd   : > { %2228 = vmatmul.mubr.msk.bf16.vlgmr.msra.gmra.mxu1 %vm1055_vm11, %v1355_v23  ;;  %2245 = vmatprep.subr.bf16.mxu0 %v2310_v3 }
 0x2c0   : > { %2246 = vmatpush3.bf16.msra.mxu0 %v2310_v3 }
 0x2c1   : > { %2247 = vmatprep.subr.bf16.mxu0 %v2311_v0 }
 0x2c4   : > { %2248 = vmatpush3.bf16.msra.mxu0 %v2311_v0 }
 0x2c5   : > { %v2185_v25 = vpop.f32.mrf.mxu1  ;;  %2249 = vmatprep.subr.bf16.mxu0 %v2312_v16 }
 0x2c6   : > { %v2894_v33 = vadd.f32 %v2185_v25, %v2857_v52 }
 0x2c7   : > { %v1130_v29 = vpop.f32.mrf.mxu1 }
 0x2c8   : > { %v2888_v7 = vadd.f32 %v1130_v29, %v2857_v52  ;;  %v1344_v51 = vmul.f32 %v2894_v33, %v2894_v33  ;;  %2250 = vmatpush3.bf16.msra.mxu0 %v2312_v16 }
 0x2c9   : > { %v2186_v20 = vpop.f32.mrf.mxu1 }
 0x2ca   : > { %v2891_v31 = vadd.f32 %v2186_v20, %v2857_v52  ;;  %v1342_v44 = vmul.f32 %v2888_v7, %v2888_v7 }
 0x2cb   : > { %v1133_v34 = vpop.f32.mrf.mxu1 }
 0x2cc   : > { %v2897_v42 = vadd.f32 %v1133_v34, %v2857_v52  ;;  %v1345_v40 = vmul.f32 %v2891_v31, %v2891_v31  ;;  %v1180_v15 = vpack.c.bf16 %v2891_v31, %v2894_v33 }
 0x2ce   : > { %v1179_v45 = vpack.c.bf16 %v2897_v42, %v2888_v7  ;;  %v1343_v47 = vmul.f32 %v2897_v42, %v2897_v42  ;;  %v2189_v48 = vpop.f32.mrf.mxu1  ;;  %v1357_v28 = vpack.c.bf16 %v1345_v40, %v1344_v51 }
 0x2cf   : > { %v2922_v9 = vadd.f32 %v2189_v48, %v2857_v52 }
 0x2d0   : > { %v1356_v54 = vpack.c.bf16 %v1343_v47, %v1342_v44  ;;  %2207 = vmatprep.mubr.msk.bf16.mxu0 %vm1055_vm11, %v1179_v45  ;;  %v1146_v49 = vpop.f32.mrf.mxu1 }
 0x2d1   : > { %2208 = vmatmul.mubr.msk.bf16.gmra.mxu0 %vm1055_vm11, %v1180_v15  ;;  %v2916_v21 = vadd.f32 %v1146_v49, %v2857_v52  ;;  %v1348_v50 = vmul.f32 %v2922_v9, %v2922_v9 }
 0x2d2   : > { %2231 = vmatprep.mubr.msk.bf16.mxu1 %vm1055_vm11, %v1356_v54  ;;  %v2190_v17 = vpop.f32.mrf.mxu1 }
 0x2d3   : > { %2232 = vmatmul.mubr.msk.bf16.gmra.mxu1 %vm1055_vm11, %v1357_v28  ;;  %v2919_v56 = vadd.f32 %v2190_v17, %v2857_v52  ;;  %v1346_v26 = vmul.f32 %v2916_v21, %v2916_v21 }
 0x2d4   : > { %v1149_v24 = vpop.f32.mrf.mxu1 }
 0x2d5   : > { %v2925_v46 = vadd.f32 %v1149_v24, %v2857_v52  ;;  %v1349_v37 = vmul.f32 %v2919_v56, %v2919_v56  ;;  %v1182_v61 = vpack.c.bf16 %v2919_v56, %v2922_v9 }
 0x2d7   : > { %v1181_v58 = vpack.c.bf16 %v2925_v46, %v2916_v21  ;;  %v1347_v6 = vmul.f32 %v2925_v46, %v2925_v46  ;;  %v1359_v1 = vpack.c.bf16 %v1349_v37, %v1348_v50 }
 0x2d9   : > { %v1358_v62 = vpack.c.bf16 %v1347_v6, %v1346_v26  ;;  %2211 = vmatprep.mubr.msk.bf16.mxu0 %vm1055_vm11, %v1181_v58  ;;  %v1597_v58 = vsub.s32 3, %v2618_v27 }
 0x2da   : > { %2212 = vmatmul.mubr.msk.bf16.gmra.mxu0 %vm1055_vm11, %v1182_v61 }
 0x2db   : > { %2235 = vmatprep.mubr.msk.bf16.mxu1 %vm1055_vm11, %v1358_v62 }
 0x2dc   : > { %2236 = vmatmul.mubr.msk.bf16.gmra.mxu1 %vm1055_vm11, %v1359_v1 }
 0x2e0   : > { %v2193_v13 = vpop.f32.mrf.mxu1 }
 0x2e1   : > { %v2950_v60 = vadd.f32 %v2193_v13, %v2857_v52 }
 0x2e2   : > { %v1162_v57 = vpop.f32.mrf.mxu1 }
 0x2e3   : > { %v2944_v59 = vadd.f32 %v1162_v57, %v2857_v52  ;;  %v1352_v12 = vmul.f32 %v2950_v60, %v2950_v60 }
 0x2e4   : > { %v2194_v38 = vpop.f32.mrf.mxu1 }
 0x2e5   : > { %v2947_v53 = vadd.f32 %v2194_v38, %v2857_v52  ;;  %v1350_v8 = vmul.f32 %v2944_v59, %v2944_v59 }
 0x2e6   : > { %v1165_v2 = vpop.f32.mrf.mxu1 }
 0x2e7   : > { %v2953_v4 = vadd.f32 %v1165_v2, %v2857_v52  ;;  %v1353_v41 = vmul.f32 %v2947_v53, %v2947_v53  ;;  %v1184_v10 = vpack.c.bf16 %v2947_v53, %v2950_v60 }
 0x2e9   : > { %v1183_v11 = vpack.c.bf16 %v2953_v4, %v2944_v59  ;;  %v1351_v32 = vmul.f32 %v2953_v4, %v2953_v4  ;;  %v1361_v5 = vpack.c.bf16 %v1353_v41, %v1352_v12 }
 0x2eb   : > { %v1360_v52 = vpack.c.bf16 %v1351_v32, %v1350_v8  ;;  %2215 = vmatprep.mubr.msk.bf16.mxu0 %vm1055_vm11, %v1183_v11  ;;  %v2995_v11 = vrot.slane %v2624_v30, %v1597_v58 }
 0x2ec   : > { %2216 = vmatmul.mubr.msk.bf16.gmra.mxu0 %vm1055_vm11, %v1184_v10 }
 0x2ed   : > { %2239 = vmatprep.mubr.msk.bf16.mxu1 %vm1055_vm11, %v1360_v52 }
 0x2ee   : > { %2240 = vmatmul.mubr.msk.bf16.gmra.mxu1 %vm1055_vm11, %v1361_v5 }
 0x37b   : > { %v2205_v18 = vpop.f32.mrf.mxu0 }
 0x37c   : > { %v1485_v22 = vmul.f32 %v2205_v18, %v2205_v18  ;;  %v1533_v1 = vsub.f32 %v2866_v14, %v2205_v18  ;;  %v1617_v14 = vsub.s32 4, %v2618_v27 }
 0x37d   : > { %v1275_v35 = vpop.f32.mrf.mxu0  ;;  %v2229_v36 = vpop.f32.mrf.mxu1 }
 0x37e   : > { %v1483_v43 = vmul.f32 %v1275_v35, %v1275_v35  ;;  %v1501_v23 = vsub.f32 %v2229_v36, %v1485_v22  ;;  %v1531_v38 = vsub.f32 %v2860_v55, %v1275_v35 }
 0x37f   : > { %v2206_v25 = vpop.f32.mrf.mxu0  ;;  %v1420_v29 = vpop.f32.mrf.mxu1 }
 0x380   : > { %v1517_v20 = vmax.f32 %v1501_v23, 0.0  ;;  %v1486_v34 = vmul.f32 %v2206_v25, %v2206_v25  ;;  %v1499_v40 = vsub.f32 %v1420_v29, %v1483_v43  ;;  %v1534_v32 = vsub.f32 %v2863_v39, %v2206_v25 }
 0x381   : > { %v1278_v44 = vpop.f32.mrf.mxu0  ;;  %v2230_v45 = vpop.f32.mrf.mxu1 }
 0x382   : > { %v1549_v47 = vadd.f32 1e-05, %v1517_v20  ;;  %v1515_v48 = vmax.f32 %v1499_v40, 0.0  ;;  %v1484_v51 = vmul.f32 %v1278_v44, %v1278_v44  ;;  %v1502_v15 = vsub.f32 %v2230_v45, %v1486_v34 }
 0x383   : > { %v1423_v54 = vpop.f32.mrf.mxu1  ;;  %v1532_v16 = vsub.f32 %v2869_v63, %v1278_v44  ;;  %v3010_v20 = vrot.slane %v2624_v30, %v1617_v14 }
 0x384   : > { %v1547_v49 = vadd.f32 1e-05, %v1515_v48  ;;  %v1500_v28 = vsub.f32 %v1423_v54, %v1484_v51  ;;  %2409 = vrsqrt.f32 %v1549_v47  ;;  %v1518_v17 = vmax.f32 %v1502_v15, 0.0 }
 0x386   : > { %2411 = vrsqrt.f32 %v1547_v49  ;;  %v1516_v24 = vmax.f32 %v1500_v28, 0.0  ;;  %v1550_v37 = vadd.f32 1e-05, %v1518_v17 }
 0x388   : > { %v1548_v26 = vadd.f32 1e-05, %v1516_v24  ;;  %2413 = vrsqrt.f32 %v1550_v37 }
 0x38a   : > { %2415 = vrsqrt.f32 %v1548_v26 }
 0x391   : > { %v2984_v6 = vpop.f32.mrf.mxu0  ;;  %v2410_v50 = vpop.eup %2409 }
 0x392   : > { %v1489_v61 = vmul.f32 %v2984_v6, %v2984_v6  ;;  %v1581_v8 = vmul.f32 %v2410_v50, %v1533_v1 }
 0x393   : > { %v2412_v62 = vpop.eup %2411  ;;  %v2989_v13 = vpop.f32.mrf.mxu0 }
 0x394   : > { %v2233_v57 = vpop.f32.mrf.mxu1  ;;  %v1487_v2 = vmul.f32 %v2989_v13, %v2989_v13  ;;  %v1579_v3 = vmul.f32 %v2412_v62, %v1531_v38  ;;  %v1601_v34 = vmul.f32 %v2995_v11, %v1581_v8 }
 0x395   : > { %v1505_v41 = vsub.f32 %v2233_v57, %v1489_v61  ;;  %v2998_v12 = vpop.f32.mrf.mxu0  ;;  %v2414_v52 = vpop.eup %2413 }
 0x396   : > { %v1436_v10 = vpop.f32.mrf.mxu1  ;;  %v1490_v55 = vmul.f32 %v2998_v12, %v2998_v12  ;;  %v1582_v18 = vmul.f32 %v2414_v52, %v1534_v32  ;;  %v1599_v45 = vmul.f32 %v2995_v11, %v1579_v3  ;;  %v1621_v57 = vadd.f32 %v3010_v20, %v1601_v34 }
 0x397   : > { %v1521_v5 = vmax.f32 %v1505_v41, 0.0  ;;  %v1503_v19 = vsub.f32 %v1436_v10, %v1487_v2  ;;  %v2416_v0 = vpop.eup %2415  ;;  %v3004_v22 = vpop.f32.mrf.mxu0 }
 0x398   : > { %v2234_v35 = vpop.f32.mrf.mxu1  ;;  %v1488_v43 = vmul.f32 %v3004_v22, %v3004_v22  ;;  %v1602_v27 = vmul.f32 %v2995_v11, %v1582_v18  ;;  %v1580_v29 = vmul.f32 %v2416_v0, %v1532_v16  ;;  %v1619_v50 = vadd.f32 %v3010_v20, %v1599_v45 }
 0x399   : > { %v1553_v39 = vadd.f32 1e-05, %v1521_v5  ;;  %v1519_v36 = vmax.f32 %v1503_v19, 0.0  ;;  %v1506_v23 = vsub.f32 %v2234_v35, %v1490_v55 }
 0x39a   : > { %v1439_v25 = vpop.f32.mrf.mxu1  ;;  %v3013_v44 = vpop.f32.mrf.mxu0  ;;  %v1600_v51 = vmul.f32 %v2995_v11, %v1580_v29  ;;  %v1622_v24 = vadd.f32 %v3010_v20, %v1602_v27  ;;  %v1537_v27 = vsub.f32 %v2894_v33, %v2984_v6 }
 0x39b   : > { %v1551_v63 = vadd.f32 1e-05, %v1519_v36  ;;  %v1504_v40 = vsub.f32 %v1439_v25, %v1488_v43  ;;  %2417 = vrsqrt.f32 %v1553_v39  ;;  %v1522_v47 = vmax.f32 %v1506_v23, 0.0 }
 0x39c   : > { %v1493_v48 = vmul.f32 %v3013_v44, %v3013_v44  ;;  %v3019_v54 = vpop.f32.mrf.mxu0  ;;  %v2237_v30 = vpop.f32.mrf.mxu1  ;;  %v1620_v61 = vadd.f32 %v3010_v20, %v1600_v51  ;;  %v1636_v52 = vpack.c.bf16 %v1622_v24, %v1621_v57  ;;  %v1535_v36 = vsub.f32 %v2888_v7, %v2989_v13 }
 0x39d   : > { %2419 = vrsqrt.f32 %v1551_v63  ;;  %v1520_v15 = vmax.f32 %v1504_v40, 0.0  ;;  %v1554_v49 = vadd.f32 1e-05, %v1522_v47  ;;  %v1491_v28 = vmul.f32 %v3019_v54, %v3019_v54 }
 0x39e   : > { %v1509_v17 = vsub.f32 %v2237_v30, %v1493_v48  ;;  %v3024_v26 = vpop.f32.mrf.mxu0  ;;  %v1452_v58 = vpop.f32.mrf.mxu1  ;;  %v1635_v2 = vpack.c.bf16 %v1620_v61, %v1619_v50  ;;  %v1538_v25 = vsub.f32 %v2891_v31, %v2998_v12  ;;  %v1536_v63 = vsub.f32 %v2897_v42, %v3004_v22 }
 0x39f   : > { %v1552_v37 = vadd.f32 1e-05, %v1520_v15  ;;  %2421 = vrsqrt.f32 %v1554_v49  ;;  %v1494_v1 = vmul.f32 %v3024_v26, %v3024_v26  ;;  %v1507_v38 = vsub.f32 %v1452_v58, %v1491_v28 }
 0x3a0   : > { %v1525_v62 = vmax.f32 %v1509_v17, 0.0  ;;  %v3031_v41 = vpop.f32.mrf.mxu0  ;;  %v2238_v8 = vpop.f32.mrf.mxu1  ;;  %2251 = vmatprep.mubr.msk.bf16.mxu0 %vm1055_vm11, %v1635_v2  ;;  %v1541_v22 = vsub.f32 %v2922_v9, %v3013_v44  ;;  %v1539_v15 = vsub.f32 %v2916_v21, %v3019_v54  ;;  %v1542_v24 = vsub.f32 %v2919_v56, %v3024_v26 }
 0x3a1   : > { %2423 = vrsqrt.f32 %v1552_v37  ;;  %v1492_v10 = vmul.f32 %v3031_v41, %v3031_v41  ;;  %v1510_v14 = vsub.f32 %v2238_v8, %v1494_v1  ;;  %v1523_v5 = vmax.f32 %v1507_v38, 0.0  ;;  %2252 = vmatmul.mubr.msk.bf16.vlgmr.msra.gmra.mxu0 %vm1055_vm11, %v1636_v52 }
 0x3a2   : > { %v1557_v32 = vadd.f32 1e-05, %v1525_v62  ;;  %v1455_v55 = vpop.f32.mrf.mxu1  ;;  %v1540_v9 = vsub.f32 %v2925_v46, %v3031_v41 }
 0x3a3   : > { %v1526_v19 = vmax.f32 %v1510_v14, 0.0  ;;  %v1508_v3 = vsub.f32 %v1455_v55, %v1492_v10  ;;  %v1555_v0 = vadd.f32 1e-05, %v1523_v5 }
 0x3a4   : > { %2425 = vrsqrt.f32 %v1557_v32 }
 0x3a5   : > { %v1558_v16 = vadd.f32 1e-05, %v1526_v19  ;;  %v1524_v18 = vmax.f32 %v1508_v3, 0.0  ;;  %2427 = vrsqrt.f32 %v1555_v0 }
 0x3a7   : > { %2429 = vrsqrt.f32 %v1558_v16  ;;  %v1556_v35 = vadd.f32 1e-05, %v1524_v18 }
 0x3a8   : > { %v2418_v39 = vpop.eup %2417 }
 0x3a9   : > { %2431 = vrsqrt.f32 %v1556_v35  ;;  %v1585_v29 = vmul.f32 %v2418_v39, %v1537_v27 }
 0x3aa   : > { %v2420_v43 = vpop.eup %2419 }
 0x3ab   : > { %v1583_v23 = vmul.f32 %v2420_v43, %v1535_v36  ;;  %v1605_v51 = vmul.f32 %v2995_v11, %v1585_v29 }
 0x3ac   : > { %v2422_v34 = vpop.eup %2421  ;;  %v3045_v40 = vpop.f32.mrf.mxu0 }
 0x3ad   : > { %v1497_v7 = vmul.f32 %v3045_v40, %v3045_v40  ;;  %v1586_v13 = vmul.f32 %v2422_v34, %v1538_v25  ;;  %v1603_v48 = vmul.f32 %v2995_v11, %v1583_v23  ;;  %v1625_v26 = vadd.f32 %v3010_v20, %v1605_v51 }
 0x3ae   : > { %v2424_v45 = vpop.eup %2423  ;;  %v3049_v47 = vpop.f32.mrf.mxu0 }
 0x3af   : > { %v2241_v33 = vpop.f32.mrf.mxu1  ;;  %v1584_v6 = vmul.f32 %v2424_v45, %v1536_v63  ;;  %v1495_v31 = vmul.f32 %v3049_v47, %v3049_v47  ;;  %v1606_v42 = vmul.f32 %v2995_v11, %v1586_v13  ;;  %v1623_v44 = vadd.f32 %v3010_v20, %v1603_v48 }
 0x3b0   : > { %v1513_v12 = vsub.f32 %v2241_v33, %v1497_v7  ;;  %v3060_v30 = vpop.f32.mrf.mxu0  ;;  %v1543_v13 = vsub.f32 %v2944_v59, %v3049_v47 }
 0x3b1   : > { %v1468_v49 = vpop.f32.mrf.mxu1  ;;  %v1604_v28 = vmul.f32 %v2995_v11, %v1584_v6  ;;  %v2426_v17 = vpop.eup %2425  ;;  %v1498_v58 = vmul.f32 %v3060_v30, %v3060_v30  ;;  %v1626_v62 = vadd.f32 %v3010_v20, %v1606_v42  ;;  %v1545_v6 = vsub.f32 %v2950_v60, %v3045_v40 }
 0x3b2   : > { %v1529_v37 = vmax.f32 %v1513_v12, 0.0  ;;  %v1511_v50 = vsub.f32 %v1468_v49, %v1495_v31  ;;  %v1326_v54 = vpop.f32.mrf.mxu0  ;;  %v2428_v1 = vpop.eup %2427  ;;  %v1589_v46 = vmul.f32 %v2426_v17, %v1541_v22  ;;  %v1546_v31 = vsub.f32 %v2947_v53, %v3060_v30 }
 0x3b3   : > { %v1624_v21 = vadd.f32 %v3010_v20, %v1604_v28  ;;  %v2242_v61 = vpop.f32.mrf.mxu1  ;;  %v1496_v56 = vmul.f32 %v1326_v54, %v1326_v54  ;;  %v1587_v14 = vmul.f32 %v2428_v1, %v1539_v15  ;;  %v1638_v52 = vpack.c.bf16 %v1626_v62, %v1625_v26 }
 0x3b4   : > { %v1561_v57 = vadd.f32 1e-05, %v1529_v37  ;;  %v1527_v38 = vmax.f32 %v1511_v50, 0.0  ;;  %v2430_v2 = vpop.eup %2429  ;;  %v1514_v32 = vsub.f32 %v2242_v61, %v1498_v58  ;;  %v1609_v36 = vmul.f32 %v2995_v11, %v1589_v46  ;;  %v3105_v37 = vld [vmem:[%s3172_s7] ss:$0 sm:$0xff] }
 0x3b5   : > { %v1637_v8 = vpack.c.bf16 %v1624_v21, %v1623_v44  ;;  %v1471_v10 = vpop.f32.mrf.mxu1  ;;  %v1590_v55 = vmul.f32 %v2430_v2, %v1542_v24  ;;  %v1607_v0 = vmul.f32 %v2995_v11, %v1587_v14  ;;  %v1544_v42 = vsub.f32 %v2953_v4, %v1326_v54 }
 0x3b6   : > { %v1559_v41 = vadd.f32 1e-05, %v1527_v38  ;;  %v1512_v5 = vsub.f32 %v1471_v10, %v1496_v56  ;;  %v2432_v19 = vpop.eup %2431  ;;  %2433 = vrsqrt.f32 %v1561_v57  ;;  %v1530_v3 = vmax.f32 %v1514_v32, 0.0 }
 0x3b7   : > { %2255 = vmatprep.mubr.msk.bf16.mxu0 %vm1055_vm11, %v1637_v8  ;;  %v1588_v18 = vmul.f32 %v2432_v19, %v1540_v9  ;;  %v1610_v35 = vmul.f32 %v2995_v11, %v1590_v55  ;;  %v1627_v25 = vadd.f32 %v3010_v20, %v1607_v0  ;;  %v1629_v34 = vadd.f32 %v3010_v20, %v1609_v36 }
 0x3b8   : > { %2435 = vrsqrt.f32 %v1559_v41  ;;  %2256 = vmatmul.mubr.msk.bf16.gmra.mxu0 %vm1055_vm11, %v1638_v52  ;;  %v1528_v16 = vmax.f32 %v1512_v5, 0.0  ;;  %v1562_v39 = vadd.f32 1e-05, %v1530_v3 }
 0x3b9   : > { %v1608_v27 = vmul.f32 %v2995_v11, %v1588_v18  ;;  %v1630_v23 = vadd.f32 %v3010_v20, %v1610_v35 }
 0x3ba   : > { %v1560_v43 = vadd.f32 1e-05, %v1528_v16  ;;  %2437 = vrsqrt.f32 %v1562_v39 }
 0x3bb   : > { %v1628_v29 = vadd.f32 %v3010_v20, %v1608_v27  ;;  %v1640_v45 = vpack.c.bf16 %v1630_v23, %v1629_v34 }
 0x3bc   : > { %2439 = vrsqrt.f32 %v1560_v43 }
 0x3bd   : > { %v1639_v63 = vpack.c.bf16 %v1628_v29, %v1627_v25 }
 0x3bf   : > { %2259 = vmatprep.mubr.msk.bf16.mxu0 %vm1055_vm11, %v1639_v63 }
 0x3c0   : > { %2260 = vmatmul.mubr.msk.bf16.gmra.mxu0 %vm1055_vm11, %v1640_v45 }
 0x3c3   : > { %v2434_v7 = vpop.eup %2433 }
 0x3c4   : > { %v1593_v12 = vmul.f32 %v2434_v7, %v1545_v6 }
 0x3c5   : > { %v2436_v33 = vpop.eup %2435 }
 0x3c6   : > { %v1591_v48 = vmul.f32 %v2436_v33, %v1543_v13  ;;  %v1613_v59 = vmul.f32 %v2995_v11, %v1593_v12 }
 0x3c7   : > { %v2438_v51 = vpop.eup %2437 }
 0x3c8   : > { %v1594_v15 = vmul.f32 %v2438_v51, %v1546_v31  ;;  %v1611_v28 = vmul.f32 %v2995_v11, %v1591_v48  ;;  %v1633_v4 = vadd.f32 %v3010_v20, %v1613_v59 }
 0x3c9   : > { %v2440_v22 = vpop.eup %2439 }
 0x3ca   : > { %v1592_v49 = vmul.f32 %v2440_v22, %v1544_v42  ;;  %v1614_v47 = vmul.f32 %v2995_v11, %v1594_v15  ;;  %v1631_v53 = vadd.f32 %v3010_v20, %v1611_v28 }
 0x3cc   : > { %v1612_v60 = vmul.f32 %v2995_v11, %v1592_v49  ;;  %v1634_v40 = vadd.f32 %v3010_v20, %v1614_v47 }
 0x3ce   : > { %v1632_v30 = vadd.f32 %v3010_v20, %v1612_v60  ;;  %v1642_v24 = vpack.c.bf16 %v1634_v40, %v1633_v4 }
 0x3d0   : > { %v1641_v17 = vpack.c.bf16 %v1632_v30, %v1631_v53 }
 0x3d2   : > { %2263 = vmatprep.mubr.msk.bf16.mxu0 %vm1055_vm11, %v1641_v17 }
 0x3d3   : > { %2264 = vmatmul.mubr.msk.bf16.gmra.mxu0 %vm1055_vm11, %v1642_v24 }
 0x461   : > { %v2253_v11 = vpop.f32.mrf.mxu0 }
 0x462   : > { %v1749_v58 = vadd.f32 %v2253_v11, %v3105_v37 }
 0x463   : > { %v1740_v20 = vpop.f32.mrf.mxu0 }
 0x464   : > { %v2061_v50 = vpack.c.bf16 %v1749_v58, %v1749_v58  ;;  %v1741_v9 = vadd.f32 %v3105_v37, %v1740_v20 }
 0x465   : > { %v2254_v44 = vpop.f32.mrf.mxu0 }
 0x466   : > { %1870 = vst.msk [vmem:[%s3113_s11 + $0x8] sm:$0xf] %vm1867_vm3, %v2061_v50  ;;  %v2059_v21 = vpack.c.bf16 %v1741_v9, %v1741_v9  ;;  %v1752_v54 = vadd.f32 %v2254_v44, %v3105_v37 }
 0x467   : > { %v1743_v61 = vpop.f32.mrf.mxu0 }
 0x468   : > { %1868 = vst.msk [vmem:[%s3113_s11] sm:$0xf] %vm1867_vm3, %v2059_v21  ;;  %v2062_v62 = vpack.c.bf16 %v1752_v54, %v1752_v54  ;;  %v1744_v1 = vadd.f32 %v3105_v37, %v1743_v61 }
 0x46a   : > { %1871 = vst.msk [vmem:[%s3113_s11 + $0xc] sm:$0xf] %vm1867_vm3, %v2062_v62  ;;  %v2060_v57 = vpack.c.bf16 %v1744_v1, %v1744_v1 }
 0x46c   : > { %1869 = vst.msk [vmem:[%s3113_s11 + $0x4] sm:$0xf] %vm1867_vm3, %v2060_v57 }
 0x478   : > { %v2257_v38 = vpop.f32.mrf.mxu0 }
 0x479   : > { %v1765_v56 = vadd.f32 %v2257_v38, %v3105_v37 }
 0x47a   : > { %v1756_v26 = vpop.f32.mrf.mxu0 }
 0x47b   : > { %v2065_v2 = vpack.c.bf16 %v1765_v56, %v1765_v56  ;;  %v1757_v8 = vadd.f32 %v3105_v37, %v1756_v26 }
 0x47c   : > { %v2258_v32 = vpop.f32.mrf.mxu0 }
 0x47d   : > { %1874 = vst.msk [vmem:[%s3113_s11 + $0x18] sm:$0xf] %vm1867_vm3, %v2065_v2  ;;  %v2063_v10 = vpack.c.bf16 %v1757_v8, %v1757_v8  ;;  %v1768_v14 = vadd.f32 %v2258_v32, %v3105_v37 }
 0x47e   : > { %v1759_v46 = vpop.f32.mrf.mxu0 }
 0x47f   : > { %1872 = vst.msk [vmem:[%s3113_s11 + $0x10] sm:$0xf] %vm1867_vm3, %v2063_v10  ;;  %v2066_v41 = vpack.c.bf16 %v1768_v14, %v1768_v14  ;;  %v1760_v52 = vadd.f32 %v3105_v37, %v1759_v46 }
 0x480   : > { %v2261_v55 = vpop.f32.mrf.mxu0 }
 0x481   : > { %1875 = vst.msk [vmem:[%s3113_s11 + $0x1c] sm:$0xf] %vm1867_vm3, %v2066_v41  ;;  %v2064_v5 = vpack.c.bf16 %v1760_v52, %v1760_v52  ;;  %v1781_v19 = vadd.f32 %v2261_v55, %v3105_v37 }
 0x482   : > { %v1772_v3 = vpop.f32.mrf.mxu0 }
 0x483   : > { %1873 = vst.msk [vmem:[%s3113_s11 + $0x14] sm:$0xf] %vm1867_vm3, %v2064_v5  ;;  %v2069_v0 = vpack.c.bf16 %v1781_v19, %v1781_v19  ;;  %v1773_v16 = vadd.f32 %v3105_v37, %v1772_v3 }
 0x484   : > { %v2262_v18 = vpop.f32.mrf.mxu0 }
 0x485   : > { %1878 = vst.msk [vmem:[%s3113_s11 + $0x28] sm:$0xf] %vm1867_vm3, %v2069_v0  ;;  %v2067_v35 = vpack.c.bf16 %v1773_v16, %v1773_v16  ;;  %v1784_v39 = vadd.f32 %v2262_v18, %v3105_v37 }
 0x486   : > { %v1775_v36 = vpop.f32.mrf.mxu0 }
 0x487   : > { %1876 = vst.msk [vmem:[%s3113_s11 + $0x20] sm:$0xf] %vm1867_vm3, %v2067_v35  ;;  %v2070_v43 = vpack.c.bf16 %v1784_v39, %v1784_v39  ;;  %v1776_v27 = vadd.f32 %v3105_v37, %v1775_v36 }
 0x489   : > { %1879 = vst.msk [vmem:[%s3113_s11 + $0x2c] sm:$0xf] %vm1867_vm3, %v2070_v43  ;;  %v2068_v23 = vpack.c.bf16 %v1776_v27, %v1776_v27 }
 0x48b   : > { %1877 = vst.msk [vmem:[%s3113_s11 + $0x24] sm:$0xf] %vm1867_vm3, %v2068_v23 }
 0x493   : > { %v2265_v25 = vpop.f32.mrf.mxu0 }
 0x494   : > { %v1797_v29 = vadd.f32 %v2265_v25, %v3105_v37 }
 0x495   : > { %v1788_v34 = vpop.f32.mrf.mxu0 }
 0x496   : > { %v2073_v63 = vpack.c.bf16 %v1797_v29, %v1797_v29  ;;  %v1789_v45 = vadd.f32 %v3105_v37, %v1788_v34 }
 0x497   : > { %v2266_v7 = vpop.f32.mrf.mxu0 }
 0x498   : > { %1882 = vst.msk [vmem:[%s3113_s11 + $0x38] sm:$0xf] %vm1867_vm3, %v2073_v63  ;;  %v2071_v13 = vpack.c.bf16 %v1789_v45, %v1789_v45  ;;  %v1800_v33 = vadd.f32 %v2266_v7, %v3105_v37 }
 0x499   : > { %v1791_v6 = vpop.f32.mrf.mxu0 }
 0x49a   : > { %1880 = vst.msk [vmem:[%s3113_s11 + $0x30] sm:$0xf] %vm1867_vm3, %v2071_v13  ;;  %v2074_v48 = vpack.c.bf16 %v1800_v33, %v1800_v33  ;;  %v1792_v31 = vadd.f32 %v3105_v37, %v1791_v6 }
 0x49c   : > { %1883 = vst.msk [vmem:[%s3113_s11 + $0x3c] sm:$0xf] %vm1867_vm3, %v2074_v48  ;;  %v2072_v12 = vpack.c.bf16 %v1792_v31, %v1792_v31 }
 0x49e   : > { %1881 = vst.msk [vmem:[%s3113_s11 + $0x34] sm:$0xf] %vm1867_vm3, %v2072_v12 }
 0x49f PF: > { %s18_s27 = sadd.s32 1, %s2447_s27  }
 0x4a0   : > { %p15_p4 = scmp.ge.s32.totalorder %s18_s27, 10  }
 0x4a2   :  { %17 = sbr.rel (!%p15_p4) target bundleno = 1 (0x1), region = 82 }

</bundles_post_ra>
